<compile_context>
chip_gen: v5e
topology: v5e:2x2
jax: 0.10.0
libtpu: 0.0.40
codegen_flags: <defaults>
</compile_context>

<pallas_src>
import functools

import jax
import jax.numpy as jnp
from jax.experimental import pallas as pl
from jax.experimental.pallas import tpu as pltpu


_SQRT_HALF = 0.7071067811865476   # CNNEncoder.scale = sqrt(0.5)
_NEG_BIG = -1e30                  # fill for padded tagset lanes (exp -> 0)
_LANE = 128
_SUBLANE = 8

_VMEM = pl.BlockSpec(memory_space=pltpu.MemorySpace.VMEM)


def _ceil_to(x, m):
    return ((x + m - 1) // m) * m


# ---------------------------------------------------------------------------
# Fused kernel: embedding gather (one-hot matmul) + emb2hidden
#               + encoder conv/GLU stack + decoder conv/GLU stack
#               + fc1 + log_softmax.  Everything stays resident in VMEM.
# ---------------------------------------------------------------------------
def cnn_seq2seq_kernel(seq_ref, tok_emb_ref, pos_emb_ref,
                       e2h_w_ref, e2h_b_ref,
                       conv_w_ref, conv_b_ref,
                       fc_w_ref, fc_b_ref,
                       out_ref, *, num_enc_layers):
    n = out_ref.shape[0]
    Vp = tok_emb_ref.shape[0]
    Hp = e2h_w_ref.shape[1]
    max_k = conv_w_ref.shape[1] // Hp
    num_layers = conv_w_ref.shape[0]
    f32, bf16 = jnp.float32, jnp.bfloat16

    # Hoisted iotas (JAX does not CSE broadcast_in_dim inside unrolled loops).
    vocab_idx = jax.lax.broadcasted_iota(jnp.int32, (n, Vp), 1)
    row_idx = jax.lax.broadcasted_iota(jnp.int32, (n, Hp), 0)

    # ---- token-embedding gather, done in-kernel as a one-hot MXU matmul ----
    onehot = (vocab_idx == seq_ref[...]).astype(bf16)                     # (n, Vp)
    tok = jnp.dot(onehot, tok_emb_ref[...], preferred_element_type=f32)   # (n, Ep)
    # TODO(synk): reference sets pos_emb = 0 and calls torch.stack(token_emb,
    # pos_emb) (non-executable); implemented as the intended element-wise sum.
    embedded = tok + pos_emb_ref[pl.ds(0, n), :]                          # f32

    # ---- emb2hidden ----
    h = (jnp.dot(embedded.astype(bf16), e2h_w_ref[...],
                 preferred_element_type=f32) + e2h_b_ref[...])            # (n, Hp)

    def conv_glu(x, l):
        """Causal Conv1d(H, 2H, k, padding=k-1) + GLU as ONE fused MXU matmul:
        im2col(x) (n, max_k*Hp) @ W_l (max_k*Hp, 2*Hp); both GLU halves live in
        the 2*Hp output lanes.  Tap shifts via pltpu.roll (XLU) + iota mask."""
        taps = []
        for j in range(max_k):                         # static, fully unrolled
            s = max_k - 1 - j                          # tap j reads x[t - s]
            if s == 0:
                taps.append(x)
            else:
                shifted = pltpu.roll(x, shift=s, axis=0)
                taps.append(jnp.where(row_idx < s, 0.0, shifted))
        im2col = jnp.concatenate(taps, axis=1).astype(bf16)   # (n, max_k*Hp)
        y2 = (jnp.dot(im2col, conv_w_ref[l], preferred_element_type=f32)
              + conv_b_ref[l])                                 # (n, 2*Hp)
        # F.glu convention: first half linear, second half gate.
        return y2[:, :Hp] * jax.nn.sigmoid(y2[:, Hp:])

    # ---- encoder (dropout is identity in eval mode) ----
    for l in range(num_enc_layers):
        y = conv_glu(h, l)
        # TODO(synk): reference `torch.stack(out, inp)` interpreted as the
        # ConvS2S residual add.
        h = (y + h) * _SQRT_HALF

    # ---- decoder ----
    # TODO(synk): reference decoder sets inp = 0, never chains layer outputs,
    # and calls nn.MultiheadAttention on the constants (0, 0, 0) then discards
    # the result; implemented as a conv/GLU stack over the encoder output,
    # attention omitted.
    for l in range(num_enc_layers, num_layers):
        h = conv_glu(h, l)

    # ---- fc1 + log_softmax (eval mode) ----
    # Padded tagset lanes carry bias -1e30 so they vanish under exp().
    logits = (jnp.dot(h.astype(bf16), fc_w_ref[...],
                      preferred_element_type=f32) + fc_b_ref[...])        # (n, Tp)
    m = jnp.max(logits, axis=-1, keepdims=True)
    lse = m + jnp.log(jnp.sum(jnp.exp(logits - m), axis=-1, keepdims=True))
    out_ref[...] = logits - lse


# ---------------------------------------------------------------------------
# Wrapper: one pallas_call, lane-dense output trimmed outside the kernel.
# ---------------------------------------------------------------------------
def forward(seq, p):
    n = int(seq.shape[0])
    n_p = _ceil_to(max(n, _SUBLANE), _SUBLANE)
    assert n_p <= p["pos_emb"].shape[0], "sequence longer than max_input_len"

    seq_col = jnp.zeros((n_p, 1), jnp.int32).at[:n, 0].set(seq.astype(jnp.int32))

    kernel = functools.partial(cnn_seq2seq_kernel,
                               num_enc_layers=p["enc_num_layers"])
    out_padded = pl.pallas_call(
        kernel,
        out_shape=jax.ShapeDtypeStruct((n_p, p["fc_w"].shape[1]), jnp.float32),
        in_specs=[_VMEM] * 9,
        out_specs=_VMEM,
    )(seq_col, p["tok_emb"], p["pos_emb"], p["e2h_w"], p["e2h_b"],
      p["conv_w"], p["conv_b"], p["fc_w"], p["fc_b"])

    return out_padded[:n, :p["tagset_size"]]


# ---------------------------------------------------------------------------
# Deterministic params in torch-equivalent layouts, plus one-time host-side
# repacking into fused, 128-lane-padded, MXU-ready slabs.
# ---------------------------------------------------------------------------
def init_params(key, *, embedding_dim, hidden_dim, vocab_size, max_input_len,
                tagset_size, enc_kernel_size, enc_num_layers,
                dec_kernel_size, dec_num_layers):
    E, H, T = embedding_dim, hidden_dim, tagset_size
    ks = jax.random.split(key, 10)

    def u(k, shape, bound):
        return jax.random.uniform(k, shape, jnp.float32, -bound, bound)

    return {
        # torch-equivalent layouts
        "tok_emb": jax.random.normal(ks[0], (vocab_size, E), jnp.float32),
        "pos_emb": jax.random.normal(ks[1], (max_input_len, E), jnp.float32),
        "e2h_w": u(ks[2], (H, E), E ** -0.5),                      # Linear (out, in)
        "e2h_b": u(ks[3], (H,), E ** -0.5),
        "enc_conv_w": u(ks[4], (enc_num_layers, 2 * H, H, enc_kernel_size),
                        (H * enc_kernel_size) ** -0.5),            # Conv1d (out, in, k)
        "enc_conv_b": u(ks[5], (enc_num_layers, 2 * H),
                        (H * enc_kernel_size) ** -0.5),
        "dec_conv_w": u(ks[6], (dec_num_layers, 2 * H, H, dec_kernel_size),
                        (H * dec_kernel_size) ** -0.5),
        "dec_conv_b": u(ks[7], (dec_num_layers, 2 * H),
                        (H * dec_kernel_size) ** -0.5),
        "fc_w": u(ks[8], (T, H), H ** -0.5),                       # Linear (out, in)
        "fc_b": u(ks[9], (T,), H ** -0.5),
    }


def pack_params(raw, *, enc_kernel_size, dec_kernel_size, enc_num_layers,
                dec_num_layers, tagset_size):
    f32, bf16 = jnp.float32, jnp.bfloat16
    V, E = raw["tok_emb"].shape
    M = raw["pos_emb"].shape[0]
    H = raw["e2h_w"].shape[0]
    T = tagset_size
    Vp, Ep, Hp, Tp = (_ceil_to(V, _LANE), _ceil_to(E, _LANE),
                      _ceil_to(H, _LANE), _ceil_to(T, _LANE))
    Mp = _ceil_to(M, _SUBLANE)
    max_k = max(enc_kernel_size, dec_kernel_size)

    def pad2(x, rows, cols, dtype, fill=0.0):
        out = jnp.full((rows, cols), fill, dtype)
        return out.at[:x.shape[0], :x.shape[1]].set(x.astype(dtype))

    def pack_conv(w, b, k):
        # w: (L, 2H, H, k) torch Conv1d layout; b: (L, 2H).
        # -> (L, max_k*Hp, 2*Hp): tap j of a size-k kernel is placed at block
        #    max_k - k + j so the kernel's im2col (which reads x[t-(max_k-1)+j])
        #    reproduces causal left-zero padding; GLU linear half -> lanes
        #    [0, H), gate half -> lanes [Hp, Hp+H).
        L = w.shape[0]
        w_slab = jnp.zeros((L, max_k * Hp, 2 * Hp), f32)
        b_slab = jnp.zeros((L, 1, 2 * Hp), f32)
        for j in range(k):
            blk = max_k - k + j
            wj = jnp.transpose(w[:, :, :, j], (0, 2, 1))          # (L, H, 2H)
            w_slab = w_slab.at[:, blk * Hp:blk * Hp + H, :H].set(wj[:, :, :H])
            w_slab = w_slab.at[:, blk * Hp:blk * Hp + H, Hp:Hp + H].set(wj[:, :, H:])
        b_slab = b_slab.at[:, 0, :H].set(b[:, :H])
        b_slab = b_slab.at[:, 0, Hp:Hp + H].set(b[:, H:])
        return w_slab.astype(bf16), b_slab

    enc_w, enc_b = pack_conv(raw["enc_conv_w"], raw["enc_conv_b"], enc_kernel_size)
    dec_w, dec_b = pack_conv(raw["dec_conv_w"], raw["dec_conv_b"], dec_kernel_size)

    return {
        "tok_emb": pad2(raw["tok_emb"], Vp, Ep, bf16),
        "pos_emb": pad2(raw["pos_emb"], Mp, Ep, f32),
        "e2h_w": pad2(raw["e2h_w"].T, Ep, Hp, bf16),
        "e2h_b": pad2(raw["e2h_b"][None, :], 1, Hp, f32),
        "conv_w": jnp.concatenate([enc_w, dec_w], axis=0),
        "conv_b": jnp.concatenate([enc_b, dec_b], axis=0),
        "fc_w": pad2(raw["fc_w"].T, Hp, Tp, bf16),
        "fc_b": pad2(raw["fc_b"][None, :], 1, Tp, f32, fill=_NEG_BIG),
        "tagset_size": T,
        "enc_num_layers": enc_num_layers,
    }


# ---------------------------------------------------------------------------
# Main
# ---------------------------------------------------------------------------
if __name__ == "__main__":
    # Module hyperparameters (dropout_p / num_heads are inert in the eval-mode
    # forward: dropout is identity, attention output is discarded by the reference).
    embedding_dim = 16
    hidden_dim = 32
    vocab_size = 50
    max_input_len = 32
    tagset_size = 8
    enc_kernel_size = 3
    enc_num_layers = 2
    dec_kernel_size = 3
    dec_num_layers = 2
    n = 8  # sequence length

    key = jax.random.PRNGKey(0)
    pkey, skey = jax.random.split(key)
    raw = init_params(pkey,
                      embedding_dim=embedding_dim, hidden_dim=hidden_dim,
                      vocab_size=vocab_size, max_input_len=max_input_len,
                      tagset_size=tagset_size,
                      enc_kernel_size=enc_kernel_size,
                      enc_num_layers=enc_num_layers,
                      dec_kernel_size=dec_kernel_size,
                      dec_num_layers=dec_num_layers)
    params = pack_params(raw,
                         enc_kernel_size=enc_kernel_size,
                         dec_kernel_size=dec_kernel_size,
                         enc_num_layers=enc_num_layers,
                         dec_num_layers=dec_num_layers,
                         tagset_size=tagset_size)
    seq = jax.random.randint(skey, (n,), 0, vocab_size, dtype=jnp.int32)

    out = forward(seq, params)
    out = jax.block_until_ready(out)

    assert out.shape == (n, tagset_size), out.shape
    assert bool(jnp.all(jnp.isfinite(out)))
    # log_softmax rows should sum (in prob space) to ~1.
    assert bool(jnp.all(jnp.abs(jnp.sum(jnp.exp(out), axis=1) - 1.0) < 1e-3))
    print("KERNEL_OK")
</pallas_src>

<mosaic_0001>
module attributes {stable_mosaic.version = 11 : i64} {
  func.func @cnn_seq2seq_kernel(%arg0: memref<8x1xi32, #tpu.memory_space<vmem>>, %arg1: memref<128x128xbf16, #tpu.memory_space<vmem>>, %arg2: memref<32x128xf32, #tpu.memory_space<vmem>>, %arg3: memref<128x128xbf16, #tpu.memory_space<vmem>>, %arg4: memref<1x128xf32, #tpu.memory_space<vmem>>, %arg5: memref<4x384x256xbf16, #tpu.memory_space<vmem>>, %arg6: memref<4x1x256xf32, #tpu.memory_space<vmem>>, %arg7: memref<128x128xbf16, #tpu.memory_space<vmem>>, %arg8: memref<1x128xf32, #tpu.memory_space<vmem>>, %arg9: memref<8x128xf32, #tpu.memory_space<vmem>>) attributes {dimension_semantics = [], scalar_prefetch = 0 : i64, scratch_operands = 0 : i64, tpu.core_type = #tpu.core_type<tc>} {
    %0 = tpu.iota {dimensions = array<i32: 1>} : vector<8x128xi32>
    %1 = tpu.iota {dimensions = array<i32: 0>} : vector<8x128xi32>
    %c0 = arith.constant 0 : index
    %c0_0 = arith.constant 0 : index
    %2 = vector.load %arg0[%c0, %c0_0] : memref<8x1xi32, #tpu.memory_space<vmem>>, vector<8x1xi32>
    %3 = vector.broadcast %2 : vector<8x1xi32> to vector<8x128xi32>
    %4 = arith.cmpi eq, %0, %3 : vector<8x128xi32>
    %5 = arith.extui %4 : vector<8x128xi1> to vector<8x128xi32>
    %6 = arith.sitofp %5 : vector<8x128xi32> to vector<8x128xf32>
    %7 = arith.truncf %6 : vector<8x128xf32> to vector<8x128xbf16>
    %c0_1 = arith.constant 0 : index
    %c0_2 = arith.constant 0 : index
    %8 = vector.load %arg1[%c0_1, %c0_2] : memref<128x128xbf16, #tpu.memory_space<vmem>>, vector<128x128xbf16>
    %cst = arith.constant dense<0.000000e+00> : vector<8x128xf32>
    %9 = tpu.matmul %7, %8, %cst {dimension_numbers = #tpu.dot_dimension_numbers<[1], [0], [0], [1], [0, 0, 1, 1], [], []>} : vector<8x128xbf16>, vector<128x128xbf16>, vector<8x128xf32> -> vector<8x128xf32>
    %c0_3 = arith.constant 0 : index
    %c0_4 = arith.constant 0 : index
    %10 = vector.load %arg2[%c0_3, %c0_4] : memref<32x128xf32, #tpu.memory_space<vmem>>, vector<8x128xf32>
    %11 = arith.addf %9, %10 : vector<8x128xf32>
    %12 = arith.truncf %11 : vector<8x128xf32> to vector<8x128xbf16>
    %c0_5 = arith.constant 0 : index
    %c0_6 = arith.constant 0 : index
    %13 = vector.load %arg3[%c0_5, %c0_6] : memref<128x128xbf16, #tpu.memory_space<vmem>>, vector<128x128xbf16>
    %cst_7 = arith.constant dense<0.000000e+00> : vector<8x128xf32>
    %14 = tpu.matmul %12, %13, %cst_7 {dimension_numbers = #tpu.dot_dimension_numbers<[1], [0], [0], [1], [0, 0, 1, 1], [], []>} : vector<8x128xbf16>, vector<128x128xbf16>, vector<8x128xf32> -> vector<8x128xf32>
    %c0_8 = arith.constant 0 : index
    %c0_9 = arith.constant 0 : index
    %15 = vector.load %arg4[%c0_8, %c0_9] : memref<1x128xf32, #tpu.memory_space<vmem>>, vector<1x128xf32>
    %16 = vector.broadcast %15 : vector<1x128xf32> to vector<8x128xf32>
    %17 = arith.addf %14, %16 : vector<8x128xf32>
    %c2_i32 = arith.constant 2 : i32
    %18 = tpu.dynamic_rotate %17 by %c2_i32 dim 0 : vector<8x128xf32>, i32 -> vector<8x128xf32>
    %c2_i32_10 = arith.constant 2 : i32
    %19 = vector.broadcast %c2_i32_10 : i32 to vector<8x128xi32>
    %20 = arith.cmpi slt, %1, %19 : vector<8x128xi32>
    %cst_11 = arith.constant 0.000000e+00 : f32
    %21 = vector.broadcast %cst_11 : f32 to vector<8x128xf32>
    %22 = arith.select %20, %21, %18 : vector<8x128xi1>, vector<8x128xf32>
    %c1_i32 = arith.constant 1 : i32
    %23 = tpu.dynamic_rotate %17 by %c1_i32 dim 0 : vector<8x128xf32>, i32 -> vector<8x128xf32>
    %c1_i32_12 = arith.constant 1 : i32
    %24 = vector.broadcast %c1_i32_12 : i32 to vector<8x128xi32>
    %25 = arith.cmpi slt, %1, %24 : vector<8x128xi32>
    %cst_13 = arith.constant 0.000000e+00 : f32
    %26 = vector.broadcast %cst_13 : f32 to vector<8x128xf32>
    %27 = arith.select %25, %26, %23 : vector<8x128xi1>, vector<8x128xf32>
    %28 = tpu.concatenate %22, %27, %17 in 1 : vector<8x128xf32>, vector<8x128xf32>, vector<8x128xf32> -> vector<8x384xf32>
    %29 = arith.truncf %28 : vector<8x384xf32> to vector<8x384xbf16>
    %c0_14 = arith.constant 0 : index
    %c0_15 = arith.constant 0 : index
    %c0_16 = arith.constant 0 : index
    %30 = vector.load %arg5[%c0_14, %c0_15, %c0_16] : memref<4x384x256xbf16, #tpu.memory_space<vmem>>, vector<1x384x256xbf16>
    %31 = vector.shape_cast %30 : vector<1x384x256xbf16> to vector<384x256xbf16>
    %cst_17 = arith.constant dense<0.000000e+00> : vector<8x256xf32>
    %32 = tpu.matmul %29, %31, %cst_17 {dimension_numbers = #tpu.dot_dimension_numbers<[1], [0], [0], [1], [0, 0, 1, 1], [], []>} : vector<8x384xbf16>, vector<384x256xbf16>, vector<8x256xf32> -> vector<8x256xf32>
    %c0_18 = arith.constant 0 : index
    %c0_19 = arith.constant 0 : index
    %c0_20 = arith.constant 0 : index
    %33 = vector.load %arg6[%c0_18, %c0_19, %c0_20] : memref<4x1x256xf32, #tpu.memory_space<vmem>>, vector<1x1x256xf32>
    %34 = vector.shape_cast %33 : vector<1x1x256xf32> to vector<1x256xf32>
    %35 = vector.broadcast %34 : vector<1x256xf32> to vector<8x256xf32>
    %36 = arith.addf %32, %35 : vector<8x256xf32>
    %37 = vector.extract_strided_slice %36 {offsets = [0, 0], sizes = [8, 128], strides = [1, 1]} : vector<8x256xf32> to vector<8x128xf32>
    %38 = vector.extract_strided_slice %36 {offsets = [0, 128], sizes = [8, 128], strides = [1, 1]} : vector<8x256xf32> to vector<8x128xf32>
    %39 = arith.negf %38 : vector<8x128xf32>
    %40 = math.exp %39 : vector<8x128xf32>
    %cst_21 = arith.constant 1.000000e+00 : f32
    %41 = vector.broadcast %cst_21 : f32 to vector<8x128xf32>
    %42 = arith.addf %41, %40 : vector<8x128xf32>
    %43 = arith.divf %41, %42 : vector<8x128xf32>
    %44 = arith.mulf %37, %43 : vector<8x128xf32>
    %45 = arith.addf %44, %17 : vector<8x128xf32>
    %cst_22 = arith.constant 0.707106769 : f32
    %46 = vector.broadcast %cst_22 : f32 to vector<8x128xf32>
    %47 = arith.mulf %45, %46 : vector<8x128xf32>
    %c2_i32_23 = arith.constant 2 : i32
    %48 = tpu.dynamic_rotate %47 by %c2_i32_23 dim 0 : vector<8x128xf32>, i32 -> vector<8x128xf32>
    %c2_i32_24 = arith.constant 2 : i32
    %49 = vector.broadcast %c2_i32_24 : i32 to vector<8x128xi32>
    %50 = arith.cmpi slt, %1, %49 : vector<8x128xi32>
    %cst_25 = arith.constant 0.000000e+00 : f32
    %51 = vector.broadcast %cst_25 : f32 to vector<8x128xf32>
    %52 = arith.select %50, %51, %48 : vector<8x128xi1>, vector<8x128xf32>
    %c1_i32_26 = arith.constant 1 : i32
    %53 = tpu.dynamic_rotate %47 by %c1_i32_26 dim 0 : vector<8x128xf32>, i32 -> vector<8x128xf32>
    %c1_i32_27 = arith.constant 1 : i32
    %54 = vector.broadcast %c1_i32_27 : i32 to vector<8x128xi32>
    %55 = arith.cmpi slt, %1, %54 : vector<8x128xi32>
    %cst_28 = arith.constant 0.000000e+00 : f32
    %56 = vector.broadcast %cst_28 : f32 to vector<8x128xf32>
    %57 = arith.select %55, %56, %53 : vector<8x128xi1>, vector<8x128xf32>
    %58 = tpu.concatenate %52, %57, %47 in 1 : vector<8x128xf32>, vector<8x128xf32>, vector<8x128xf32> -> vector<8x384xf32>
    %59 = arith.truncf %58 : vector<8x384xf32> to vector<8x384xbf16>
    %c1 = arith.constant 1 : index
    %c0_29 = arith.constant 0 : index
    %c0_30 = arith.constant 0 : index
    %60 = vector.load %arg5[%c1, %c0_29, %c0_30] : memref<4x384x256xbf16, #tpu.memory_space<vmem>>, vector<1x384x256xbf16>
    %61 = vector.shape_cast %60 : vector<1x384x256xbf16> to vector<384x256xbf16>
    %cst_31 = arith.constant dense<0.000000e+00> : vector<8x256xf32>
    %62 = tpu.matmul %59, %61, %cst_31 {dimension_numbers = #tpu.dot_dimension_numbers<[1], [0], [0], [1], [0, 0, 1, 1], [], []>} : vector<8x384xbf16>, vector<384x256xbf16>, vector<8x256xf32> -> vector<8x256xf32>
    %c1_32 = arith.constant 1 : index
    %c0_33 = arith.constant 0 : index
    %c0_34 = arith.constant 0 : index
    %63 = vector.load %arg6[%c1_32, %c0_33, %c0_34] : memref<4x1x256xf32, #tpu.memory_space<vmem>>, vector<1x1x256xf32>
    %64 = vector.shape_cast %63 : vector<1x1x256xf32> to vector<1x256xf32>
    %65 = vector.broadcast %64 : vector<1x256xf32> to vector<8x256xf32>
    %66 = arith.addf %62, %65 : vector<8x256xf32>
    %67 = vector.extract_strided_slice %66 {offsets = [0, 0], sizes = [8, 128], strides = [1, 1]} : vector<8x256xf32> to vector<8x128xf32>
    %68 = vector.extract_strided_slice %66 {offsets = [0, 128], sizes = [8, 128], strides = [1, 1]} : vector<8x256xf32> to vector<8x128xf32>
    %69 = arith.negf %68 : vector<8x128xf32>
    %70 = math.exp %69 : vector<8x128xf32>
    %cst_35 = arith.constant 1.000000e+00 : f32
    %71 = vector.broadcast %cst_35 : f32 to vector<8x128xf32>
    %72 = arith.addf %71, %70 : vector<8x128xf32>
    %73 = arith.divf %71, %72 : vector<8x128xf32>
    %74 = arith.mulf %67, %73 : vector<8x128xf32>
    %75 = arith.addf %74, %47 : vector<8x128xf32>
    %cst_36 = arith.constant 0.707106769 : f32
    %76 = vector.broadcast %cst_36 : f32 to vector<8x128xf32>
    %77 = arith.mulf %75, %76 : vector<8x128xf32>
    %c2_i32_37 = arith.constant 2 : i32
    %78 = tpu.dynamic_rotate %77 by %c2_i32_37 dim 0 : vector<8x128xf32>, i32 -> vector<8x128xf32>
    %c2_i32_38 = arith.constant 2 : i32
    %79 = vector.broadcast %c2_i32_38 : i32 to vector<8x128xi32>
    %80 = arith.cmpi slt, %1, %79 : vector<8x128xi32>
    %cst_39 = arith.constant 0.000000e+00 : f32
    %81 = vector.broadcast %cst_39 : f32 to vector<8x128xf32>
    %82 = arith.select %80, %81, %78 : vector<8x128xi1>, vector<8x128xf32>
    %c1_i32_40 = arith.constant 1 : i32
    %83 = tpu.dynamic_rotate %77 by %c1_i32_40 dim 0 : vector<8x128xf32>, i32 -> vector<8x128xf32>
    %c1_i32_41 = arith.constant 1 : i32
    %84 = vector.broadcast %c1_i32_41 : i32 to vector<8x128xi32>
    %85 = arith.cmpi slt, %1, %84 : vector<8x128xi32>
    %cst_42 = arith.constant 0.000000e+00 : f32
    %86 = vector.broadcast %cst_42 : f32 to vector<8x128xf32>
    %87 = arith.select %85, %86, %83 : vector<8x128xi1>, vector<8x128xf32>
    %88 = tpu.concatenate %82, %87, %77 in 1 : vector<8x128xf32>, vector<8x128xf32>, vector<8x128xf32> -> vector<8x384xf32>
    %89 = arith.truncf %88 : vector<8x384xf32> to vector<8x384xbf16>
    %c2 = arith.constant 2 : index
    %c0_43 = arith.constant 0 : index
    %c0_44 = arith.constant 0 : index
    %90 = vector.load %arg5[%c2, %c0_43, %c0_44] : memref<4x384x256xbf16, #tpu.memory_space<vmem>>, vector<1x384x256xbf16>
    %91 = vector.shape_cast %90 : vector<1x384x256xbf16> to vector<384x256xbf16>
    %cst_45 = arith.constant dense<0.000000e+00> : vector<8x256xf32>
    %92 = tpu.matmul %89, %91, %cst_45 {dimension_numbers = #tpu.dot_dimension_numbers<[1], [0], [0], [1], [0, 0, 1, 1], [], []>} : vector<8x384xbf16>, vector<384x256xbf16>, vector<8x256xf32> -> vector<8x256xf32>
    %c2_46 = arith.constant 2 : index
    %c0_47 = arith.constant 0 : index
    %c0_48 = arith.constant 0 : index
    %93 = vector.load %arg6[%c2_46, %c0_47, %c0_48] : memref<4x1x256xf32, #tpu.memory_space<vmem>>, vector<1x1x256xf32>
    %94 = vector.shape_cast %93 : vector<1x1x256xf32> to vector<1x256xf32>
    %95 = vector.broadcast %94 : vector<1x256xf32> to vector<8x256xf32>
    %96 = arith.addf %92, %95 : vector<8x256xf32>
    %97 = vector.extract_strided_slice %96 {offsets = [0, 0], sizes = [8, 128], strides = [1, 1]} : vector<8x256xf32> to vector<8x128xf32>
    %98 = vector.extract_strided_slice %96 {offsets = [0, 128], sizes = [8, 128], strides = [1, 1]} : vector<8x256xf32> to vector<8x128xf32>
    %99 = arith.negf %98 : vector<8x128xf32>
    %100 = math.exp %99 : vector<8x128xf32>
    %cst_49 = arith.constant 1.000000e+00 : f32
    %101 = vector.broadcast %cst_49 : f32 to vector<8x128xf32>
    %102 = arith.addf %101, %100 : vector<8x128xf32>
    %103 = arith.divf %101, %102 : vector<8x128xf32>
    %104 = arith.mulf %97, %103 : vector<8x128xf32>
    %c2_i32_50 = arith.constant 2 : i32
    %105 = tpu.dynamic_rotate %104 by %c2_i32_50 dim 0 : vector<8x128xf32>, i32 -> vector<8x128xf32>
    %c2_i32_51 = arith.constant 2 : i32
    %106 = vector.broadcast %c2_i32_51 : i32 to vector<8x128xi32>
    %107 = arith.cmpi slt, %1, %106 : vector<8x128xi32>
    %cst_52 = arith.constant 0.000000e+00 : f32
    %108 = vector.broadcast %cst_52 : f32 to vector<8x128xf32>
    %109 = arith.select %107, %108, %105 : vector<8x128xi1>, vector<8x128xf32>
    %c1_i32_53 = arith.constant 1 : i32
    %110 = tpu.dynamic_rotate %104 by %c1_i32_53 dim 0 : vector<8x128xf32>, i32 -> vector<8x128xf32>
    %c1_i32_54 = arith.constant 1 : i32
    %111 = vector.broadcast %c1_i32_54 : i32 to vector<8x128xi32>
    %112 = arith.cmpi slt, %1, %111 : vector<8x128xi32>
    %cst_55 = arith.constant 0.000000e+00 : f32
    %113 = vector.broadcast %cst_55 : f32 to vector<8x128xf32>
    %114 = arith.select %112, %113, %110 : vector<8x128xi1>, vector<8x128xf32>
    %115 = tpu.concatenate %109, %114, %104 in 1 : vector<8x128xf32>, vector<8x128xf32>, vector<8x128xf32> -> vector<8x384xf32>
    %116 = arith.truncf %115 : vector<8x384xf32> to vector<8x384xbf16>
    %c3 = arith.constant 3 : index
    %c0_56 = arith.constant 0 : index
    %c0_57 = arith.constant 0 : index
    %117 = vector.load %arg5[%c3, %c0_56, %c0_57] : memref<4x384x256xbf16, #tpu.memory_space<vmem>>, vector<1x384x256xbf16>
    %118 = vector.shape_cast %117 : vector<1x384x256xbf16> to vector<384x256xbf16>
    %cst_58 = arith.constant dense<0.000000e+00> : vector<8x256xf32>
    %119 = tpu.matmul %116, %118, %cst_58 {dimension_numbers = #tpu.dot_dimension_numbers<[1], [0], [0], [1], [0, 0, 1, 1], [], []>} : vector<8x384xbf16>, vector<384x256xbf16>, vector<8x256xf32> -> vector<8x256xf32>
    %c3_59 = arith.constant 3 : index
    %c0_60 = arith.constant 0 : index
    %c0_61 = arith.constant 0 : index
    %120 = vector.load %arg6[%c3_59, %c0_60, %c0_61] : memref<4x1x256xf32, #tpu.memory_space<vmem>>, vector<1x1x256xf32>
    %121 = vector.shape_cast %120 : vector<1x1x256xf32> to vector<1x256xf32>
    %122 = vector.broadcast %121 : vector<1x256xf32> to vector<8x256xf32>
    %123 = arith.addf %119, %122 : vector<8x256xf32>
    %124 = vector.extract_strided_slice %123 {offsets = [0, 0], sizes = [8, 128], strides = [1, 1]} : vector<8x256xf32> to vector<8x128xf32>
    %125 = vector.extract_strided_slice %123 {offsets = [0, 128], sizes = [8, 128], strides = [1, 1]} : vector<8x256xf32> to vector<8x128xf32>
    %126 = arith.negf %125 : vector<8x128xf32>
    %127 = math.exp %126 : vector<8x128xf32>
    %cst_62 = arith.constant 1.000000e+00 : f32
    %128 = vector.broadcast %cst_62 : f32 to vector<8x128xf32>
    %129 = arith.addf %128, %127 : vector<8x128xf32>
    %130 = arith.divf %128, %129 : vector<8x128xf32>
    %131 = arith.mulf %124, %130 : vector<8x128xf32>
    %132 = arith.truncf %131 : vector<8x128xf32> to vector<8x128xbf16>
    %c0_63 = arith.constant 0 : index
    %c0_64 = arith.constant 0 : index
    %133 = vector.load %arg7[%c0_63, %c0_64] : memref<128x128xbf16, #tpu.memory_space<vmem>>, vector<128x128xbf16>
    %cst_65 = arith.constant dense<0.000000e+00> : vector<8x128xf32>
    %134 = tpu.matmul %132, %133, %cst_65 {dimension_numbers = #tpu.dot_dimension_numbers<[1], [0], [0], [1], [0, 0, 1, 1], [], []>} : vector<8x128xbf16>, vector<128x128xbf16>, vector<8x128xf32> -> vector<8x128xf32>
    %c0_66 = arith.constant 0 : index
    %c0_67 = arith.constant 0 : index
    %135 = vector.load %arg8[%c0_66, %c0_67] : memref<1x128xf32, #tpu.memory_space<vmem>>, vector<1x128xf32>
    %136 = vector.broadcast %135 : vector<1x128xf32> to vector<8x128xf32>
    %137 = arith.addf %134, %136 : vector<8x128xf32>
    %cst_68 = arith.constant dense<0xFF800000> : vector<8xf32>
    %138 = vector.multi_reduction <maximumf>, %137, %cst_68 [1] : vector<8x128xf32> to vector<8xf32>
    %139 = vector.shape_cast %138 : vector<8xf32> to vector<8x1xf32>
    %140 = vector.broadcast %139 : vector<8x1xf32> to vector<8x128xf32>
    %141 = arith.subf %137, %140 : vector<8x128xf32>
    %142 = math.exp %141 : vector<8x128xf32>
    %cst_69 = arith.constant dense<0.000000e+00> : vector<8xf32>
    %143 = vector.multi_reduction <add>, %142, %cst_69 [1] : vector<8x128xf32> to vector<8xf32>
    %144 = vector.shape_cast %143 : vector<8xf32> to vector<8x1xf32>
    %145 = math.log %144 : vector<8x1xf32>
    %146 = arith.addf %139, %145 : vector<8x1xf32>
    %147 = vector.broadcast %146 : vector<8x1xf32> to vector<8x128xf32>
    %148 = arith.subf %137, %147 : vector<8x128xf32>
    %c0_70 = arith.constant 0 : index
    %c0_71 = arith.constant 0 : index
    %149 = vector.load %arg9[%c0_70, %c0_71] : memref<8x128xf32, #tpu.memory_space<vmem>>, vector<8x128xf32>
    tpu.vector_store %arg9[%c0_70, %c0_71], %148 {strides = array<i32>} : memref<8x128xf32, #tpu.memory_space<vmem>>, vector<8x128xf32>,
    return
  }
}

</mosaic_0001>

<bundles_post_ra>
// kernel: tpu_custom_call.1
= control target key start
LH: loop header
LB: loop body
LE: loop exit
PB: predicated region body
PF: predicated region fallthrough
CT: control target
= control target key end

     0   :  { %14 = vsyncpa [#allocation3], 0  ;;  %s3565_s0 = inlined_call_operand.vmem [shape: s32[8,1], index: 0, kind: input, shape index: {}]   ;;  %s3566_s1 = inlined_call_operand.hbm [shape: bf16[128,128], index: 1, kind: input, shape index: {}]   ;;  %s3567_s2 = inlined_call_operand.hbm [shape: f32[32,128], index: 2, kind: input, shape index: {}]   ;;  %s3568_s3 = inlined_call_operand.hbm [shape: bf16[128,128], index: 3, kind: input, shape index: {}]   ;;  %s3569_s4 = inlined_call_operand.vmem [shape: f32[1,128], index: 4, kind: input, shape index: {}]   ;;  %s3570_s5 = inlined_call_operand.hbm [shape: bf16[4,384,256], index: 5, kind: input, shape index: {}]   ;;  %s3571_s6 = inlined_call_operand.vmem [shape: f32[4,1,256], index: 6, kind: input, shape index: {}]   ;;  %s3572_s7 = inlined_call_operand.hbm [shape: bf16[128,128], index: 7, kind: input, shape index: {}]   ;;  %s3573_s8 = inlined_call_operand.vmem [shape: f32[1,128], index: 8, kind: input, shape index: {}]   ;;  %s3574_s9 = inlined_call_operand.hbm [shape: f32[8,128], index: 9, kind: output, shape index: {}]  }
   0x1   :  { %15 = vsyncpa [#allocation6], 0 }
   0x2   :  { %16 = vsyncpa [#allocation9], 0  ;;  %s37_s11 = sshll.u32 %s3567_s2, 4  ;;  %s38_s11 = int_to_ptr.hbm [resolvable:$true] %s37_s11 }
   0x3   :  { %17 = vsyncpa [#allocation4], 0  ;;  %s3363_s12 = smov [#allocation5]   ;;  %s65_s16 = sshll.u32 %s3570_s5, 4  ;;  %s66_s16 = int_to_ptr.hbm [resolvable:$true] %s65_s16 }
   0x4   :  { %s39_s13 = sshll.u32 %s3363_s12, 4  ;;  %s3364_s17 = smov 128   ;;  %s40_s13 = int_to_ptr.vmem [resolvable:$true] %s39_s13 }
   0x5   :  { %s3365_s18 = smov 8   ;;  %s3366_s19 = smov [#allocation8]  }
   0x6   :  { %45 = dma.hbm_to_vmem [thread:$0]  %s38_s11, 512, %s40_s13, [#allocation6], %s3364_s17, %s3364_s17, %s3365_s18  }
   0x7   :  { %s67_s20 = sshll.u32 %s3366_s19, 4  ;;  %s24_s23 = sshll.u32 %s3566_s1, 4  ;;  %s68_s20 = int_to_ptr.vmem [resolvable:$true] %s67_s20  ;;  %s25_s23 = int_to_ptr.hbm [resolvable:$true] %s24_s23 }
   0x8   :  { %73 = dma.hbm_to_vmem [thread:$0]  %s66_s16, 24576, %s68_s20, [#allocation9], %s3364_s17, %s3364_s17, %s3365_s18  }
   0x9   :  { %s3367_s2 = smov [#allocation2]   ;;  %s50_s5 = sshll.u32 %s3568_s3, 4  ;;  %s51_s5 = int_to_ptr.hbm [resolvable:$true] %s50_s5 }
   0xa   :  { %s26_s24 = sshll.u32 %s3367_s2, 4  ;;  %s3368_s27 = smov 64   ;;  %s27_s24 = int_to_ptr.vmem [resolvable:$true] %s26_s24 }
   0xb   :  { %s3369_s28 = smov 4   ;;  %s3370_s29 = smov [#allocation7]  }
   0xc   :  { %32 = dma.hbm_to_vmem [thread:$0]  %s25_s23, 1024, %s27_s24, [#allocation3], %s3368_s27, %s3368_s27, %s3369_s28  }
   0xd   :  { %s52_s30 = sshll.u32 %s3370_s29, 4  ;;  %s80_s1 = sshll.u32 %s3572_s7, 4  ;;  %s53_s30 = int_to_ptr.vmem [resolvable:$true] %s52_s30  ;;  %s81_s1 = int_to_ptr.hbm [resolvable:$true] %s80_s1 }
   0xe   :  { %58 = dma.hbm_to_vmem [thread:$0]  %s51_s5, 1024, %s53_s30, [#allocation6], %s3368_s27, %s3368_s27, %s3369_s28  }
   0xf   :  { %s3371_s12 = smov [#allocation10]  }
  0x10   :  { %s82_s13 = sshll.u32 %s3371_s12, 4  ;;  %s83_s13 = int_to_ptr.vmem [resolvable:$true] %s82_s13 }
  0x11   :  { %88 = dma.hbm_to_vmem [thread:$0]  %s81_s1, 1024, %s83_s13, [#allocation9], %s3368_s27, %s3368_s27, %s3369_s28  }
  0x12   :  { %3355 = dma.done.wait [#allocation3], 1024  }
  0x13   :  { %3356 = vsyncadd [#allocation3], 4294966272 }
  0x14   :  { %3357 = dma.done.wait [#allocation6], 1536  }
  0x15   :  { %3358 = vsyncadd [#allocation6], 4294965760 }
  0x16   :  { %3359 = dma.done.wait [#allocation9], 25600  }
  0x17   :  { %3360 = vsyncadd [#allocation9], 4294941696  ;;  %v3372_v0 = vmov 0   ;;  %v115_v1 = vld [vmem:[%s3565_s0] sm:$0xff]  ;;  %v2965_v2 = vld [vmem:[#allocation2 + $0x38] sm:$0xff]  ;;  %v111_v16 = vlaneseq  ;;  %s3374_s23 = smov [#allocation11]  }
  0x18   :  { %3188 = vset.pattern.permute.xlu0 %v3372_v0  ;;  %188 = vmatpush.bf16.msra.mxu0 %v2965_v2  ;;  %v2964_v3 = vld [vmem:[#allocation2 + $0x30] sm:$0xff]  ;;  %v2963_v4 = vld [vmem:[#allocation2 + $0x28] sm:$0xff]  ;;  %v2962_v5 = vld [vmem:[#allocation2 + $0x20] sm:$0xff]  ;;  %v3373_v20 = vmov 1.0|1.0   ;;  %s1990_s2 = sshll.u32 %s3374_s23, 4  ;;  %s1991_s2 = int_to_ptr.vmem [resolvable:$true] %s1990_s2 }
  0x19   :  { %117 = vperm.xlu0 %3188, %v115_v1   ;;  %v2961_v6 = vld [vmem:[#allocation2 + $0x18] sm:$0xff]  ;;  %v2960_v7 = vld [vmem:[#allocation2 + $0x10] sm:$0xff]  ;;  %v2959_v8 = vld [vmem:[#allocation2 + $0x8] sm:$0xff]  ;;  %v112_v18 = vand.u32 127, %v111_v16 }
  0x1a   :  { %v2958_v9 = vld [vmem:[#allocation2] sm:$0xff]  ;;  %v2973_v10 = vld [vmem:[#allocation7 + $0x38] sm:$0xff]  ;;  %v2972_v11 = vld [vmem:[#allocation7 + $0x30] sm:$0xff] }
  0x1b   :  { %270 = vmatpush.bf16.msra.mxu1 %v2973_v10  ;;  %v2971_v12 = vld [vmem:[#allocation7 + $0x28] sm:$0xff]  ;;  %v2970_v13 = vld [vmem:[#allocation7 + $0x20] sm:$0xff]  ;;  %v2969_v14 = vld [vmem:[#allocation7 + $0x18] sm:$0xff] }
  0x1c   :  { %189 = vmatpush.bf16.msra.mxu0 %v2964_v3  ;;  %v2968_v15 = vld [vmem:[#allocation7 + $0x10] sm:$0xff]  ;;  %v2967_v17 = vld [vmem:[#allocation7 + $0x8] sm:$0xff]  ;;  %v2966_v21 = vld [vmem:[#allocation7] sm:$0xff] }
  0x1d   :  { %v2129_v22 = vld [vmem:[#allocation8 + $0x70] sm:$0xf]  ;;  %v2989_v23 = vld [vmem:[#allocation8 + $0x74] sm:$0xf0]  ;;  %v2121_v27 = vld [vmem:[#allocation8 + $0x60] sm:$0xf] }
  0x1e   :  { %v2193_v24 = vld [vmem:[#allocation8 + $0xf0] sm:$0xf]  ;;  %v2130_v25 = vor.u32 %v2989_v23, %v2129_v22  ;;  %v3005_v26 = vld [vmem:[#allocation8 + $0xf4] sm:$0xf0]  ;;  %v2987_v28 = vld [vmem:[#allocation8 + $0x64] sm:$0xf0] }
  0x1f   :  { %271 = vmatpush.bf16.msra.mxu1 %v2972_v11  ;;  %v2194_v29 = vor.u32 %v3005_v26, %v2193_v24  ;;  %v2185_v30 = vld [vmem:[#allocation8 + $0xe0] sm:$0xf]  ;;  %v3003_v31 = vld [vmem:[#allocation8 + $0xe4] sm:$0xf0]  ;;  %v2122_v32 = vor.u32 %v2987_v28, %v2121_v27  ;;  %v2113_v33 = vld [vmem:[#allocation8 + $0x50] sm:$0xf] }
  0x20   :  { %190 = vmatpush.bf16.msra.mxu0 %v2963_v4  ;;  %586 = vmatpush.bf16.msra.mxu2 %v2130_v25  ;;  %v2186_v34 = vor.u32 %v3003_v31, %v2185_v30  ;;  %v2985_v35 = vld [vmem:[#allocation8 + $0x54] sm:$0xf0]  ;;  %v2257_v36 = vld [vmem:[#allocation8 + $0x170] sm:$0xf]  ;;  %v2988_v41 = vld [vmem:[#allocation8 + $0x74] sm:$0xf] }
  0x21   :  { %599 = vmatpush.bf16.msra.mxu3 %v2194_v29  ;;  %v3021_v37 = vld [vmem:[#allocation8 + $0x174] sm:$0xf0]  ;;  %v2177_v38 = vld [vmem:[#allocation8 + $0xd0] sm:$0xf]  ;;  %v2131_v42 = vld [vmem:[#allocation8 + $0x78] sm:$0xf0]  ;;  %v2114_v44 = vor.u32 %v2985_v35, %v2113_v33 }
  0x22   :  { %v3001_v39 = vld [vmem:[#allocation8 + $0xd4] sm:$0xf0]  ;;  %v2258_v40 = vor.u32 %v3021_v37, %v2257_v36  ;;  %v2249_v43 = vld [vmem:[#allocation8 + $0x160] sm:$0xf]  ;;  %v2983_v46 = vld [vmem:[#allocation8 + $0x44] sm:$0xf0]  ;;  %v2134_v47 = vor.u32 %v2988_v41, %v2131_v42 }
  0x23   :  { %272 = vmatpush.bf16.msra.mxu1 %v2971_v12  ;;  %v2105_v45 = vld [vmem:[#allocation8 + $0x40] sm:$0xf]  ;;  %v3019_v48 = vld [vmem:[#allocation8 + $0x164] sm:$0xf0]  ;;  %v2178_v49 = vor.u32 %v3001_v39, %v2177_v38  ;;  %v2986_v53 = vld [vmem:[#allocation8 + $0x64] sm:$0xf] }
  0x24   :  { %191 = vmatpush.bf16.msra.mxu0 %v2962_v5  ;;  %587 = vmatpush.bf16.msra.mxu2 %v2122_v32  ;;  %v2169_v50 = vld [vmem:[#allocation8 + $0xc0] sm:$0xf]  ;;  %v2999_v51 = vld [vmem:[#allocation8 + $0xc4] sm:$0xf0]  ;;  %v2250_v52 = vor.u32 %v3019_v48, %v2249_v43  ;;  %v2123_v54 = vld [vmem:[#allocation8 + $0x68] sm:$0xf0]  ;;  %v2106_v58 = vor.u32 %v2983_v46, %v2105_v45 }
  0x25   :  { %600 = vmatpush.bf16.msra.mxu3 %v2186_v34  ;;  %v2241_v55 = vld [vmem:[#allocation8 + $0x150] sm:$0xf]  ;;  %v3017_v56 = vld [vmem:[#allocation8 + $0x154] sm:$0xf0]  ;;  %v2126_v57 = vor.u32 %v2986_v53, %v2123_v54  ;;  %v2984_v61 = vld [vmem:[#allocation8 + $0x54] sm:$0xf]  ;;  %v2170_v63 = vor.u32 %v2999_v51, %v2169_v50 }
  0x26   :  { %v2097_v59 = vld [vmem:[#allocation8 + $0x30] sm:$0xf]  ;;  %v2242_v60 = vor.u32 %v3017_v56, %v2241_v55  ;;  %v2115_v62 = vld [vmem:[#allocation8 + $0x58] sm:$0xf0]  ;;  %v2981_v0 = vld [vmem:[#allocation8 + $0x34] sm:$0xf0] }
  0x27   :  { %273 = vmatpush.bf16.msra.mxu1 %v2970_v13  ;;  %v2233_v1 = vld [vmem:[#allocation8 + $0x140] sm:$0xf]  ;;  %v3015_v2 = vld [vmem:[#allocation8 + $0x144] sm:$0xf0]  ;;  %v2161_v3 = vld [vmem:[#allocation8 + $0xb0] sm:$0xf]  ;;  %v2118_v5 = vor.u32 %v2984_v61, %v2115_v62 }
  0x28   :  { %192 = vmatpush.bf16.msra.mxu0 %v2961_v6  ;;  %588 = vmatpush.bf16.msra.mxu2 %v2114_v44  ;;  %v2997_v4 = vld [vmem:[#allocation8 + $0xb4] sm:$0xf0]  ;;  %v2982_v6 = vld [vmem:[#allocation8 + $0x44] sm:$0xf]  ;;  %v2234_v10 = vor.u32 %v3015_v2, %v2233_v1  ;;  %v2979_v12 = vld [vmem:[#allocation8 + $0x24] sm:$0xf0] }
  0x29   :  { %601 = vmatpush.bf16.msra.mxu3 %v2178_v49  ;;  %v2162_v11 = vor.u32 %v2997_v4, %v2161_v3  ;;  %v2225_v13 = vld [vmem:[#allocation8 + $0x130] sm:$0xf]  ;;  %v2977_v25 = vld [vmem:[#allocation8 + $0x14] sm:$0xf0]  ;;  %v2217_v26 = vld [vmem:[#allocation8 + $0x120] sm:$0xf] }
  0x2a   :  { %v2081_v22 = vld [vmem:[#allocation8 + $0x10] sm:$0xf]  ;;  %v3011_v27 = vld [vmem:[#allocation8 + $0x124] sm:$0xf0]  ;;  %v2993_v29 = vld [vmem:[#allocation8 + $0x94] sm:$0xf0] }
  0x2b   :  { %274 = vmatpush.bf16.msra.mxu1 %v2969_v14  ;;  %v3013_v14 = vld [vmem:[#allocation8 + $0x134] sm:$0xf0]  ;;  %v2145_v28 = vld [vmem:[#allocation8 + $0x90] sm:$0xf]  ;;  %v139_v31 = vld [vmem:[#allocation5] sm:$0xff]  ;;  %v2082_v33 = vor.u32 %v2977_v25, %v2081_v22  ;;  %v2218_v35 = vor.u32 %v3011_v27, %v2217_v26 }
  0x2c   :  { %193 = vmatpush.bf16.msra.mxu0 %v2960_v7  ;;  %v2107_v7 = vld [vmem:[#allocation8 + $0x48] sm:$0xf0]  ;;  %589 = vmatpush.bf16.msra.mxu2 %v2106_v58  ;;  %v2226_v23 = vor.u32 %v3013_v14, %v2225_v13  ;;  %v2073_v32 = vld [vmem:[#allocation8] sm:$0xf]  ;;  %v2975_v34 = vld [vmem:[#allocation8 + $0x4] sm:$0xf0]  ;;  %v2146_v39 = vor.u32 %v2993_v29, %v2145_v28 }
  0x2d   :  { %602 = vmatpush.bf16.msra.mxu3 %v2170_v63  ;;  %v2978_v36 = vld [vmem:[#allocation8 + $0x24] sm:$0xf]  ;;  %v2091_v37 = vld [vmem:[#allocation8 + $0x28] sm:$0xf0]  ;;  %v2209_v41 = vld [vmem:[#allocation8 + $0x110] sm:$0xf]  ;;  %v2074_v51 = vor.u32 %v2975_v34, %v2073_v32 }
  0x2e   :  { %v3009_v42 = vld [vmem:[#allocation8 + $0x114] sm:$0xf0]  ;;  %v2991_v44 = vld [vmem:[#allocation8 + $0x84] sm:$0xf0]  ;;  %v3004_v45 = vld [vmem:[#allocation8 + $0xf4] sm:$0xf]  ;;  %v2094_v49 = vor.u32 %v2978_v36, %v2091_v37 }
  0x2f   :  { %275 = vmatpush.bf16.msra.mxu1 %v2968_v15  ;;  %v2153_v15 = vld [vmem:[#allocation8 + $0xa0] sm:$0xf]  ;;  %v2195_v46 = vld [vmem:[#allocation8 + $0xf8] sm:$0xf0]  ;;  %v3002_v56 = vld [vmem:[#allocation8 + $0xe4] sm:$0xf] }
  0x30   :  { %194 = vmatpush.bf16.msra.mxu0 %v2959_v8  ;;  %v2098_v8 = vor.u32 %v2981_v0, %v2097_v59  ;;  %v2259_v48 = vld [vmem:[#allocation8 + $0x178] sm:$0xf0]  ;;  %v2198_v54 = vor.u32 %v3004_v45, %v2195_v46  ;;  %v3018_v58 = vld [vmem:[#allocation8 + $0x164] sm:$0xf]  ;;  %v2251_v59 = vld [vmem:[#allocation8 + $0x168] sm:$0xf0] }
  0x31   :  { %603 = vmatpush.bf16.msra.mxu3 %v2162_v11  ;;  %v2254_v62 = vor.u32 %v3018_v58, %v2251_v59  ;;  %v2976_v63 = vld [vmem:[#allocation8 + $0x14] sm:$0xf]  ;;  %v2083_v0 = vld [vmem:[#allocation8 + $0x18] sm:$0xf0]  ;;  %v2974_v11 = vld [vmem:[#allocation8 + $0x4] sm:$0xf] }
  0x32   :  { %590 = vmatpush.bf16.msra.mxu2 %v2098_v8  ;;  %v3000_v1 = vld [vmem:[#allocation8 + $0xd4] sm:$0xf]  ;;  %v2086_v2 = vor.u32 %v2976_v63, %v2083_v0  ;;  %v2179_v3 = vld [vmem:[#allocation8 + $0xd8] sm:$0xf0]  ;;  %v2201_v8 = vld [vmem:[#allocation8 + $0x100] sm:$0xf] }
  0x33   :  { %276 = vmatpush.bf16.msra.mxu1 %v2967_v17  ;;  %v2995_v17 = vld [vmem:[#allocation8 + $0xa4] sm:$0xf0]  ;;  %v3016_v4 = vld [vmem:[#allocation8 + $0x154] sm:$0xf]  ;;  %v2998_v13 = vld [vmem:[#allocation8 + $0xc4] sm:$0xf] }
  0x34   :  { %195 = vmatpush.bf16.msra.mxu0 %v2958_v9  ;;  %v2089_v9 = vld [vmem:[#allocation8 + $0x20] sm:$0xf]  ;;  %v2154_v24 = vor.u32 %v2995_v17, %v2153_v15  ;;  %v2171_v15 = vld [vmem:[#allocation8 + $0xc8] sm:$0xf0]  ;;  %v3014_v17 = vld [vmem:[#allocation8 + $0x144] sm:$0xf] }
  0x35   :  { %v2163_v22 = vld [vmem:[#allocation8 + $0xb8] sm:$0xf0]  ;;  %v2994_v27 = vld [vmem:[#allocation8 + $0xa4] sm:$0xf]  ;;  %v2155_v28 = vld [vmem:[#allocation8 + $0xa8] sm:$0xf0] }
  0x36   :  { %604 = vmatpush.bf16.msra.mxu3 %v2154_v24  ;;  %v2227_v25 = vld [vmem:[#allocation8 + $0x138] sm:$0xf0]  ;;  %v3010_v29 = vld [vmem:[#allocation8 + $0x124] sm:$0xf]  ;;  %v114_v45 = vshrl.u32 %v111_v16, 7 }
  0x37   :  { %277 = vmatpush.bf16.msra.mxu1 %v2966_v21  ;;  %v2090_v21 = vor.u32 %v2979_v12, %v2089_v9  ;;  %v3007_v9 = vld [vmem:[#allocation8 + $0x104] sm:$0xf0]  ;;  %v2075_v12 = vld [vmem:[#allocation8 + $0x8] sm:$0xf0]  ;;  %v2147_v34 = vld [vmem:[#allocation8 + $0x98] sm:$0xf0] }
  0x38   :  { %612 = vmatpush.bf16.msrb.mxu0 %v2258_v40  ;;  %v2137_v40 = vld [vmem:[#allocation8 + $0x80] sm:$0xf]  ;;  %v2078_v14 = vor.u32 %v2974_v11, %v2075_v12  ;;  %v2211_v36 = vld [vmem:[#allocation8 + $0x118] sm:$0xf0]  ;;  %vm3174_vm2 = vcmp.ge.s32.totalorder %v114_v45, 2  ;;  %vm3175_vm3 = vcmp.ge.s32.totalorder %v114_v45, 1 }
  0x39   :  { %591 = vmatpush.bf16.msra.mxu2 %v2090_v21  ;;  %v2138_v53 = vor.u32 %v2991_v44, %v2137_v40  ;;  %v2996_v21 = vld [vmem:[#allocation8 + $0xb4] sm:$0xf]  ;;  %v2139_v40 = vld [vmem:[#allocation8 + $0x88] sm:$0xf0]  ;;  %v3189_v46 = vld [vmem:[%s3569_s4] ss:$0 sm:$0xff] }
  0x3a   :  { %605 = vmatpush.bf16.msra.mxu3 %v2146_v39  ;;  %v2166_v24 = vor.u32 %v2996_v21, %v2163_v22  ;;  %v2990_v39 = vld [vmem:[#allocation8 + $0x84] sm:$0xf]  ;;  %vm3450_vm4 = vmpackc.low %vm3174_vm2, %vm3174_vm2  ;;  %v2407_v58 = vld [vmem:[#allocation8 + $0x270] sm:$0xf] }
  0x3b   :  { %625 = vmatpush.bf16.msrb.mxu1 %v2134_v47  ;;  %v3020_v47 = vld [vmem:[#allocation8 + $0x174] sm:$0xf]  ;;  %vm3458_vm5 = vmpackc.low %vm3175_vm3, %vm3175_vm3  ;;  %v3035_v63 = vld [vmem:[#allocation8 + $0x1e4] sm:$0xf0] }
  0x3c   :  { %613 = vmatpush.bf16.msrb.mxu0 %v2250_v52  ;;  %v2210_v52 = vor.u32 %v3009_v42, %v2209_v41  ;;  %v2262_v55 = vor.u32 %v3020_v47, %v2259_v48  ;;  %v3006_v41 = vld [vmem:[#allocation8 + $0x104] sm:$0xf]  ;;  %v2203_v42 = vld [vmem:[#allocation8 + $0x108] sm:$0xf0]  ;;  %v2399_v0 = vld [vmem:[#allocation8 + $0x260] sm:$0xf] }
  0x3d   :  { %592 = vmatpush.bf16.msra.mxu2 %v2082_v33  ;;  %v2992_v33 = vld [vmem:[#allocation8 + $0x94] sm:$0xf]  ;;  %v2206_v44 = vor.u32 %v3006_v41, %v2203_v42  ;;  %v2471_v11 = vld [vmem:[#allocation8 + $0x2f0] sm:$0xf]  ;;  %v3069_v12 = vld [vmem:[#allocation8 + $0x2f4] sm:$0xf0] }
  0x3e   :  { %606 = vmatpush.bf16.msra.mxu3 %v2138_v53  ;;  %v2150_v37 = vor.u32 %v2992_v33, %v2147_v34  ;;  %v2345_v21 = vld [vmem:[#allocation8 + $0x1f8] sm:$0xf0]  ;;  %v3034_v33 = vld [vmem:[#allocation8 + $0x1e4] sm:$0xf]  ;;  %v2337_v34 = vld [vmem:[#allocation8 + $0x1e8] sm:$0xf0] }
  0x3f   :  { %626 = vmatpush.bf16.msrb.mxu1 %v2126_v57  ;;  %v2187_v57 = vld [vmem:[#allocation8 + $0xe8] sm:$0xf0]  ;;  %v2367_v45 = vld [vmem:[#allocation8 + $0x220] sm:$0xf] }
  0x40   :  { %614 = vmatpush.bf16.msrb.mxu0 %v2242_v60  ;;  %v2190_v61 = vor.u32 %v3002_v56, %v2187_v57  ;;  %v2343_v56 = vld [vmem:[#allocation8 + $0x1f0] sm:$0xf]  ;;  %v3037_v57 = vld [vmem:[#allocation8 + $0x1f4] sm:$0xf0] }
  0x41   :  { %593 = vmatpush.bf16.msra.mxu2 %v2074_v51  ;;  %v2344_v59 = vor.u32 %v3037_v57, %v2343_v56  ;;  %v2447_v56 = vld [vmem:[#allocation8 + $0x2c0] sm:$0xf]  ;;  %v3063_v57 = vld [vmem:[#allocation8 + $0x2c4] sm:$0xf0] }
  0x42   :  { %651 = vmatpush.bf16.msrb.mxu3 %v2262_v55 }
  0x43   :  { %627 = vmatpush.bf16.msrb.mxu1 %v2118_v5  ;;  %v2243_v5 = vld [vmem:[#allocation8 + $0x158] sm:$0xf0] }
  0x44   :  { %615 = vmatpush.bf16.msrb.mxu0 %v2234_v10  ;;  %v2202_v10 = vor.u32 %v3007_v9, %v2201_v8  ;;  %v3049_v8 = vld [vmem:[#allocation8 + $0x254] sm:$0xf0] }
  0x45   :  { %638 = vmatpush.bf16.msrb.mxu2 %v2198_v54 }
  0x46   :  { %652 = vmatpush.bf16.msrb.mxu3 %v2254_v62  ;;  %v2335_v62 = vld [vmem:[#allocation8 + $0x1e0] sm:$0xf] }
  0x48   :  { %616 = vmatpush.bf16.msrb.mxu0 %v2226_v23  ;;  %v3012_v23 = vld [vmem:[#allocation8 + $0x134] sm:$0xf] }
  0x49   :  { %639 = vmatpush.bf16.msrb.mxu2 %v2190_v61  ;;  %v2230_v26 = vor.u32 %v3012_v23, %v2227_v25  ;;  %v2463_v25 = vld [vmem:[#allocation8 + $0x2e0] sm:$0xf] }
  0x4c   :  { %617 = vmatpush.bf16.msrb.mxu0 %v2218_v35  ;;  %v3008_v35 = vld [vmem:[#allocation8 + $0x114] sm:$0xf] }
  0x50   :  { %618 = vmatpush.bf16.msrb.mxu0 %v2210_v52  ;;  %v2712_v52 = vld [vmem:[%s3571_s6 + $0x6] sm:$0x3] }
  0x54   :  { %619 = vmatpush.bf16.msrb.mxu0 %v2202_v10 }
  0x8b   :  { %v118_v19 = vpop.permute.xlu0 %117 }
  0x8c   :  { %vm119_vm0 = vcmp.eq.s32.totalorder %v112_v18, %v118_v19  ;;  %v2110_v18 = vor.u32 %v2982_v6, %v2107_v7  ;;  %v2980_v19 = vld [vmem:[#allocation8 + $0x34] sm:$0xf]  ;;  %v2182_v6 = vor.u32 %v3000_v1, %v2179_v3  ;;  %v2246_v7 = vor.u32 %v3016_v4, %v2243_v5  ;;  %v2327_v4 = vld [vmem:[#allocation8 + $0x1d0] sm:$0xf]  ;;  %v3033_v5 = vld [vmem:[#allocation8 + $0x1d4] sm:$0xf0] }
  0x8d   :  { %vm2037_vm1 = vmpackc.low %vm119_vm0, %vm119_vm0  ;;  %v2336_v1 = vor.u32 %v3035_v63, %v2335_v62  ;;  %v3041_v63 = vld [vmem:[#allocation8 + $0x214] sm:$0xf0] }
  0x8e   :  { %2038 = vmatmul.msk.bf16.vlgmr.msra.gmra.mxu0 %vm2037_vm1, %v3373_v20  ;;  %v2099_v20 = vld [vmem:[#allocation8 + $0x38] sm:$0xf0]  ;;  %628 = vmatpush.bf16.msrb.mxu1 %v2110_v18  ;;  %v2235_v18 = vld [vmem:[#allocation8 + $0x148] sm:$0xf0] }
  0x8f   :  { %v2102_v30 = vor.u32 %v2980_v19, %v2099_v20  ;;  %640 = vmatpush.bf16.msrb.mxu2 %v2182_v6  ;;  %653 = vmatpush.bf16.msrb.mxu3 %v2246_v7  ;;  %v2174_v19 = vor.u32 %v2998_v13, %v2171_v15  ;;  %v2238_v20 = vor.u32 %v3014_v17, %v2235_v18  ;;  %v2391_v6 = vld [vmem:[#allocation8 + $0x250] sm:$0xf]  ;;  %v3031_v15 = vld [vmem:[#allocation8 + $0x1c4] sm:$0xf0]  ;;  %v2383_v17 = vld [vmem:[#allocation8 + $0x240] sm:$0xf] }
  0x90   :  { %989 = vmatpush.bf16.msra.mxu0 %v2344_v59  ;;  %v2328_v7 = vor.u32 %v3033_v5, %v2327_v4  ;;  %v2392_v9 = vor.u32 %v3049_v8, %v2391_v6  ;;  %v2472_v13 = vor.u32 %v3069_v12, %v2471_v11  ;;  %v2295_v59 = vld [vmem:[#allocation8 + $0x190] sm:$0xf]  ;;  %v3061_v8 = vld [vmem:[#allocation8 + $0x2b4] sm:$0xf0]  ;;  %v2287_v11 = vld [vmem:[#allocation8 + $0x180] sm:$0xf] }
  0x91   :  { %v3023_v12 = vld [vmem:[#allocation8 + $0x184] sm:$0xf0] }
  0x92   :  { %629 = vmatpush.bf16.msrb.mxu1 %v2102_v30  ;;  %v2158_v30 = vor.u32 %v2994_v27, %v2155_v28  ;;  %v2311_v28 = vld [vmem:[#allocation8 + $0x1b0] sm:$0xf] }
  0x93   :  { %641 = vmatpush.bf16.msrb.mxu2 %v2174_v19  ;;  %654 = vmatpush.bf16.msrb.mxu3 %v2238_v20  ;;  %v3047_v19 = vld [vmem:[#allocation8 + $0x244] sm:$0xf0]  ;;  %v3036_v20 = vld [vmem:[#allocation8 + $0x1f4] sm:$0xf] }
  0x94   :  { %990 = vmatpush.bf16.msra.mxu0 %v2336_v1  ;;  %v2384_v23 = vor.u32 %v3047_v19, %v2383_v17  ;;  %v2321_v1 = vld [vmem:[#allocation8 + $0x1c8] sm:$0xf0]  ;;  %v3028_v17 = vld [vmem:[#allocation8 + $0x1b4] sm:$0xf] }
  0x96   :  { %630 = vmatpush.bf16.msrb.mxu1 %v2094_v49 }
  0x97   :  { %642 = vmatpush.bf16.msrb.mxu2 %v2166_v24  ;;  %655 = vmatpush.bf16.msrb.mxu3 %v2230_v26  ;;  %v2348_v24 = vor.u32 %v3036_v20, %v2345_v21  ;;  %v3067_v26 = vld [vmem:[#allocation8 + $0x2e4] sm:$0xf0]  ;;  %v3052_v21 = vld [vmem:[#allocation8 + $0x274] sm:$0xf] }
  0x98   :  { %991 = vmatpush.bf16.msra.mxu0 %v2328_v7  ;;  %v2464_v27 = vor.u32 %v3067_v26, %v2463_v25  ;;  %v2439_v7 = vld [vmem:[#allocation8 + $0x2b0] sm:$0xf]  ;;  %v2473_v26 = vld [vmem:[#allocation8 + $0x2f8] sm:$0xf0] }
  0x9a   :  { %631 = vmatpush.bf16.msrb.mxu1 %v2086_v2  ;;  %v3051_v2 = vld [vmem:[#allocation8 + $0x264] sm:$0xf0] }
  0x9b   :  { %643 = vmatpush.bf16.msrb.mxu2 %v2158_v30  ;;  %v2400_v3 = vor.u32 %v3051_v2, %v2399_v0  ;;  %v2375_v30 = vld [vmem:[#allocation8 + $0x230] sm:$0xf]  ;;  %v3030_v0 = vld [vmem:[#allocation8 + $0x1c4] sm:$0xf] }
  0x9e   :  { %632 = vmatpush.bf16.msrb.mxu1 %v2078_v14  ;;  %v2319_v14 = vld [vmem:[#allocation8 + $0x1c0] sm:$0xf] }
  0x9f   :  { %644 = vmatpush.bf16.msrb.mxu2 %v2150_v37  ;;  %v2320_v18 = vor.u32 %v3031_v15, %v2319_v14  ;;  %v2288_v14 = vor.u32 %v3023_v12, %v2287_v11  ;;  %v3039_v15 = vld [vmem:[#allocation8 + $0x204] sm:$0xf0] }
  0xa1   :  { %992 = vmatpush.bf16.msra.mxu0 %v2320_v18  ;;  %v2313_v18 = vld [vmem:[#allocation8 + $0x1b8] sm:$0xf0] }
  0xa2   :  { %v2316_v20 = vor.u32 %v3028_v17, %v2313_v18  ;;  %v2441_v18 = vld [vmem:[#allocation8 + $0x2b8] sm:$0xf0] }
 0x10b   :  { %v197_v38 = vpop.f32.mrf.mxu0 }
 0x10c   :  { %v198_v43 = vadd.f32 %v197_v38, %v139_v31  ;;  %v2219_v31 = vld [vmem:[#allocation8 + $0x128] sm:$0xf0]  ;;  %v2214_v38 = vor.u32 %v3008_v35, %v2211_v36  ;;  %v2340_v36 = vor.u32 %v3034_v33, %v2337_v34  ;;  %v3050_v33 = vld [vmem:[#allocation8 + $0x264] sm:$0xf] }
 0x10d   :  { %v2222_v32 = vor.u32 %v3010_v29, %v2219_v31  ;;  %v3029_v29 = vld [vmem:[#allocation8 + $0x1b4] sm:$0xf0] }
 0x10e   :  { %v201_v50 = vpack.c.bf16 %v198_v43, %v198_v43  ;;  %v2142_v43 = vor.u32 %v2990_v39, %v2139_v40  ;;  %v2312_v31 = vor.u32 %v3029_v29, %v2311_v28  ;;  %v2455_v39 = vld [vmem:[#allocation8 + $0x2d0] sm:$0xf]  ;;  %v3065_v40 = vld [vmem:[#allocation8 + $0x2d4] sm:$0xf0]  ;;  %v3059_v28 = vld [vmem:[#allocation8 + $0x2a4] sm:$0xf0] }
 0x10f   :  { %656 = vmatpush.bf16.msrb.mxu3 %v2222_v32  ;;  %v3045_v32 = vld [vmem:[#allocation8 + $0x234] sm:$0xf0]  ;;  %v2456_v42 = vor.u32 %v3065_v40, %v2455_v39  ;;  %v3066_v39 = vld [vmem:[#allocation8 + $0x2e4] sm:$0xf]  ;;  %v2465_v40 = vld [vmem:[#allocation8 + $0x2e8] sm:$0xf0] }
 0x110   :  { %278 = vmatmul.bf16.vlgmr.msra.gmra.mxu1 %v201_v50  ;;  %645 = vmatpush.bf16.msrb.mxu2 %v2142_v43  ;;  %v2376_v35 = vor.u32 %v3045_v32, %v2375_v30  ;;  %v2303_v43 = vld [vmem:[#allocation8 + $0x1a0] sm:$0xf]  ;;  %v2305_v32 = vld [vmem:[#allocation8 + $0x1a8] sm:$0xf0] }
 0x111   :  { %993 = vmatpush.bf16.msra.mxu0 %v2312_v31  ;;  %v3026_v31 = vld [vmem:[#allocation8 + $0x1a4] sm:$0xf] }
 0x113   :  { %v199_v60 = vpop.f32.mrf.mxu0  ;;  %657 = vmatpush.bf16.msrb.mxu3 %v2214_v38 }
 0x114   :  { %v3053_v60 = vld [vmem:[#allocation8 + $0x274] sm:$0xf0] }
 0x115   :  { %v2408_v61 = vor.u32 %v3053_v60, %v2407_v58  ;;  %v2448_v58 = vor.u32 %v3063_v57, %v2447_v56  ;;  %v3025_v60 = vld [vmem:[#allocation8 + $0x194] sm:$0xf0]  ;;  %v3064_v57 = vld [vmem:[#allocation8 + $0x2d4] sm:$0xf] }
 0x116   :  { %v2296_v62 = vor.u32 %v3025_v60, %v2295_v59  ;;  %v2415_v59 = vld [vmem:[#allocation8 + $0x280] sm:$0xf] }
 0x117   :  { %658 = vmatpush.bf16.msrb.mxu3 %v2206_v44  ;;  %1002 = vmatpush.bf16.msra.mxu1 %v2408_v61  ;;  %v3027_v44 = vld [vmem:[#allocation8 + $0x1a4] sm:$0xf0]  ;;  %v2359_v61 = vld [vmem:[#allocation8 + $0x210] sm:$0xf] }
 0x118   :  { %v2360_v2 = vor.u32 %v3041_v63, %v2359_v61  ;;  %v3022_v63 = vld [vmem:[#allocation8 + $0x184] sm:$0xf] }
 0x11b   :  { %1003 = vmatpush.bf16.msra.mxu1 %v2400_v3  ;;  %v2324_v3 = vor.u32 %v3030_v0, %v2321_v1  ;;  %v2289_v0 = vld [vmem:[#allocation8 + $0x188] sm:$0xf0] }
 0x11f   :  { %1004 = vmatpush.bf16.msra.mxu1 %v2392_v9  ;;  %v2440_v9 = vor.u32 %v3061_v8, %v2439_v7  ;;  %v2449_v7 = vld [vmem:[#allocation8 + $0x2c8] sm:$0xf0] }
 0x123   :  { %1005 = vmatpush.bf16.msra.mxu1 %v2384_v23  ;;  %v2409_v23 = vld [vmem:[#allocation8 + $0x278] sm:$0xf0] }
 0x124   :  { %v2412_v25 = vor.u32 %v3052_v21, %v2409_v23  ;;  %v2369_v21 = vld [vmem:[#allocation8 + $0x228] sm:$0xf0]  ;;  %v3058_v23 = vld [vmem:[#allocation8 + $0x2a4] sm:$0xf] }
 0x127   :  { %1006 = vmatpush.bf16.msra.mxu1 %v2376_v35  ;;  %v2308_v35 = vor.u32 %v3026_v31, %v2305_v32  ;;  %v3056_v31 = vld [vmem:[#allocation8 + $0x294] sm:$0xf]  ;;  %v2425_v32 = vld [vmem:[#allocation8 + $0x298] sm:$0xf0] }
 0x18d   :  { %v279_v47 = vpop.f32.mrf.mxu1 }
 0x18e   :  { %v3448_v48 = vadd.f32 %v3189_v46, %v279_v47  ;;  %v2304_v46 = vor.u32 %v3027_v44, %v2303_v43  ;;  %v3043_v47 = vld [vmem:[#allocation8 + $0x224] sm:$0xf0]  ;;  %v2468_v44 = vor.u32 %v3066_v39, %v2465_v40  ;;  %v2353_v39 = vld [vmem:[#allocation8 + $0x208] sm:$0xf0]  ;;  %v3054_v40 = vld [vmem:[#allocation8 + $0x284] sm:$0xf] }
 0x190   :  { %v291_v50 = vpack.c.bf16 %v3448_v48, %v3448_v48  ;;  %v283_v51 = vrot.slane %v3448_v48, 6  ;;  %v286_v16 = vrot.slane %v3448_v48, 7  ;;  %994 = vmatpush.bf16.msra.mxu0 %v2304_v46  ;;  %v3057_v46 = vld [vmem:[#allocation8 + $0x294] sm:$0xf0] }
 0x192   :  { %620 = vmatmul.bf16.vlgmr.msrb.gmra.mxu0 %v291_v50  ;;  %v2266_v53 = vpack.c.bf16 %v283_v51, %v283_v51  ;;  %v2271_v54 = vpack.c.bf16 %v286_v16, %v286_v16  ;;  %v2329_v51 = vld [vmem:[#allocation8 + $0x1d8] sm:$0xf0] }
 0x194   :  { %2267 = vmatmul.msk.bf16.vlgmr.msra.gmra.mxu2 %vm3450_vm4, %v2266_v53  ;;  %2272 = vmatmul.msk.bf16.vlgmr.msra.gmra.mxu3 %vm3458_vm5, %v2271_v54 }
 0x195   :  { %2277 = vmatmul.msk.bf16.vlgmr.msrb.gmra.mxu1 %vm3450_vm4, %v2266_v53  ;;  %v281_v55 = vpop.f32.mrf.mxu1  ;;  %1015 = vmatpush.bf16.msra.mxu2 %v2472_v13  ;;  %v2368_v53 = vor.u32 %v3043_v47, %v2367_v45  ;;  %v2351_v13 = vld [vmem:[#allocation8 + $0x200] sm:$0xf]  ;;  %v2423_v45 = vld [vmem:[#allocation8 + $0x290] sm:$0xf]  ;;  %v3024_v47 = vld [vmem:[#allocation8 + $0x194] sm:$0xf] }
 0x196   :  { %1028 = vmatpush.bf16.msra.mxu3 %v2348_v24  ;;  %v3481_v55 = vld [vmem:[%s3571_s6] sm:$0x3]  ;;  %995 = vmatpush.bf16.msra.mxu0 %v2296_v62  ;;  %v2352_v19 = vor.u32 %v3039_v15, %v2351_v13  ;;  %v3068_v24 = vld [vmem:[#allocation8 + $0x2f4] sm:$0xf]  ;;  %v3055_v62 = vld [vmem:[#allocation8 + $0x284] sm:$0xf0] }
 0x197   :  { %1007 = vmatpush.bf16.msra.mxu1 %v2368_v53  ;;  %v343_v4 = vperm.slane %v3481_v55, 1  ;;  %v2476_v29 = vor.u32 %v3068_v24, %v2473_v26  ;;  %v3048_v53 = vld [vmem:[#allocation8 + $0x254] sm:$0xf]  ;;  %v2416_v1 = vor.u32 %v3055_v62, %v2415_v59 }
 0x198   :  { %v3044_v13 = vld [vmem:[#allocation8 + $0x234] sm:$0xf] }
 0x199   :  { %1016 = vmatpush.bf16.msra.mxu2 %v2464_v27  ;;  %v2431_v27 = vld [vmem:[#allocation8 + $0x2a0] sm:$0xf]  ;;  %v3060_v15 = vld [vmem:[#allocation8 + $0x2b4] sm:$0xf] }
 0x19a   :  { %1029 = vmatpush.bf16.msra.mxu3 %v2340_v36  ;;  %996 = vmatpush.bf16.msra.mxu0 %v2288_v14  ;;  %v2432_v30 = vor.u32 %v3059_v28, %v2431_v27  ;;  %v2401_v36 = vld [vmem:[#allocation8 + $0x268] sm:$0xf0]  ;;  %v2377_v14 = vld [vmem:[#allocation8 + $0x238] sm:$0xf0] }
 0x19b   :  { %1008 = vmatpush.bf16.msra.mxu1 %v2360_v2  ;;  %v2404_v43 = vor.u32 %v3050_v33, %v2401_v36  ;;  %v3046_v2 = vld [vmem:[#allocation8 + $0x244] sm:$0xf]  ;;  %v2380_v17 = vor.u32 %v3044_v13, %v2377_v14  ;;  %v2605_v13 = vld [vmem:[#allocation8 + $0x3d0] sm:$0xf] }
 0x19c   :  { %v3038_v36 = vld [vmem:[#allocation8 + $0x204] sm:$0xf] }
 0x19d   :  { %1017 = vmatpush.bf16.msra.mxu2 %v2456_v42 }
 0x19e   :  { %1041 = vmatpush.bf16.msrb.mxu0 %v2412_v25  ;;  %v2433_v25 = vld [vmem:[#allocation8 + $0x2a8] sm:$0xf0] }
 0x19f   :  { %1009 = vmatpush.bf16.msra.mxu1 %v2352_v19  ;;  %v2444_v19 = vor.u32 %v3060_v15, %v2441_v18  ;;  %v2436_v28 = vor.u32 %v3058_v23, %v2433_v25  ;;  %v3097_v15 = vld [vmem:[#allocation8 + $0x3d4] sm:$0xf0]  ;;  %v2685_v18 = vld [vmem:[#allocation8 + $0x470] sm:$0xf]  ;;  %v3079_v23 = vld [vmem:[#allocation8 + $0x344] sm:$0xf0] }
 0x1a1   :  { %1018 = vmatpush.bf16.msra.mxu2 %v2448_v58  ;;  %v2457_v58 = vld [vmem:[#allocation8 + $0x2d8] sm:$0xf0] }
 0x1a2   :  { %1042 = vmatpush.bf16.msrb.mxu0 %v2404_v43  ;;  %v2460_v61 = vor.u32 %v3064_v57, %v2457_v58  ;;  %v2356_v43 = vor.u32 %v3038_v36, %v2353_v39  ;;  %v2589_v36 = vld [vmem:[#allocation8 + $0x3b0] sm:$0xf] }
 0x1a3   :  { %1054 = vmatpush.bf16.msrb.mxu1 %v2476_v29  ;;  %v3040_v29 = vld [vmem:[#allocation8 + $0x214] sm:$0xf] }
 0x1a4   :  { %2282 = vmatmul.msk.bf16.vlgmr.msrb.gmra.mxu2 %vm3458_vm5, %v2271_v54  ;;  %659 = vmatmul.bf16.vlgmr.msrb.gmra.mxu3 %v291_v50  ;;  %v3032_v50 = vld [vmem:[#allocation8 + $0x1d4] sm:$0xf] }
 0x1a5   :  { %v2332_v54 = vor.u32 %v3032_v50, %v2329_v51  ;;  %1019 = vmatpush.bf16.msra.mxu2 %v2440_v9  ;;  %v2424_v51 = vor.u32 %v3057_v46, %v2423_v45 }
 0x1a7   :  { %1030 = vmatpush.bf16.msra.mxu3 %v2332_v54  ;;  %v2393_v54 = vld [vmem:[#allocation8 + $0x258] sm:$0xf0]  ;;  %1055 = vmatpush.bf16.msrb.mxu1 %v2468_v44 }
 0x1a8   :  { %v2396_v56 = vor.u32 %v3048_v53, %v2393_v54 }
 0x1a9   :  { %1020 = vmatpush.bf16.msra.mxu2 %v2432_v30  ;;  %v2361_v30 = vld [vmem:[#allocation8 + $0x218] sm:$0xf0] }
 0x1aa   :  { %1043 = vmatpush.bf16.msrb.mxu0 %v2396_v56  ;;  %v2364_v33 = vor.u32 %v3040_v29, %v2361_v30 }
 0x1ab   :  { %1031 = vmatpush.bf16.msra.mxu3 %v2324_v3  ;;  %v2385_v3 = vld [vmem:[#allocation8 + $0x248] sm:$0xf0]  ;;  %1056 = vmatpush.bf16.msrb.mxu1 %v2460_v61 }
 0x1ac   :  { %v2388_v8 = vor.u32 %v3046_v2, %v2385_v3  ;;  %v3101_v2 = vld [vmem:[#allocation8 + $0x3f4] sm:$0xf0] }
 0x1ad   :  { %1021 = vmatpush.bf16.msra.mxu2 %v2424_v51 }
 0x1ae   :  { %1044 = vmatpush.bf16.msrb.mxu0 %v2388_v8  ;;  %v3099_v8 = vld [vmem:[#allocation8 + $0x3e4] sm:$0xf0] }
 0x1af   :  { %1032 = vmatpush.bf16.msra.mxu3 %v2316_v20  ;;  %v3042_v20 = vld [vmem:[#allocation8 + $0x224] sm:$0xf] }
 0x1b0   :  { %v2372_v27 = vor.u32 %v3042_v20, %v2369_v21  ;;  %v2533_v21 = vld [vmem:[#allocation8 + $0x340] sm:$0xf] }
 0x1b1   :  { %1022 = vmatpush.bf16.msra.mxu2 %v2416_v1  ;;  %v2534_v25 = vor.u32 %v3079_v23, %v2533_v21  ;;  %v3076_v21 = vld [vmem:[#allocation8 + $0x334] sm:$0xf]  ;;  %v2527_v23 = vld [vmem:[#allocation8 + $0x338] sm:$0xf0] }
 0x1b2   :  { %1045 = vmatpush.bf16.msrb.mxu0 %v2380_v17  ;;  %v2606_v17 = vor.u32 %v3097_v15, %v2605_v13  ;;  %v3109_v13 = vld [vmem:[#allocation8 + $0x434] sm:$0xf0]  ;;  %v2501_v15 = vld [vmem:[#allocation8 + $0x300] sm:$0xf] }
 0x1b3   :  { %1033 = vmatpush.bf16.msra.mxu3 %v2308_v35  ;;  %v2428_v35 = vor.u32 %v3056_v31, %v2425_v32  ;;  %v2677_v31 = vld [vmem:[#allocation8 + $0x460] sm:$0xf]  ;;  %v3115_v32 = vld [vmem:[#allocation8 + $0x464] sm:$0xf0] }
 0x1b6   :  { %1046 = vmatpush.bf16.msrb.mxu0 %v2372_v27  ;;  %v3084_v27 = vld [vmem:[#allocation8 + $0x374] sm:$0xf] }
 0x1ba   :  { %1047 = vmatpush.bf16.msrb.mxu0 %v2364_v33  ;;  %v2678_v33 = vor.u32 %v3115_v32, %v2677_v31  ;;  %v2687_v31 = vld [vmem:[#allocation8 + $0x478] sm:$0xf0]  ;;  %v2645_v32 = vld [vmem:[#allocation8 + $0x420] sm:$0xf] }
 0x1be   :  { %1048 = vmatpush.bf16.msrb.mxu0 %v2356_v43 }
 0x20f   :  { %v3470_v10 = vpop.f32.mrf.mxu0 }
 0x212   :  { %v3472_v22 = vpop.f32.mrf.mxu1 }
 0x213   :  { %v635_v34 = vadd.f32 %v3472_v22, %v343_v4  ;;  %v3062_v4 = vld [vmem:[#allocation8 + $0x2c4] sm:$0xf] }
 0x214   :  { %v2452_v9 = vor.u32 %v3062_v4, %v2449_v7  ;;  %v2549_v4 = vld [vmem:[#allocation8 + $0x360] sm:$0xf] }
 0x216   :  { %1057 = vmatpush.bf16.msrb.mxu1 %v2452_v9 }
 0x217   :  { %v3474_v37 = vpop.f32.mrf.mxu2  ;;  %v3476_v38 = vpop.f32.mrf.mxu3 }
 0x218   :  { %v623_v41 = vpop.f32.mrf.mxu0 }
 0x21a   :  { %v636_v16 = vpop.f32.mrf.mxu1  ;;  %1058 = vmatpush.bf16.msrb.mxu1 %v2444_v19  ;;  %v3117_v19 = vld [vmem:[#allocation8 + $0x474] sm:$0xf0] }
 0x21b   :  { %v2297_v16 = vld [vmem:[#allocation8 + $0x198] sm:$0xf0]  ;;  %v2686_v20 = vor.u32 %v3117_v19, %v2685_v18  ;;  %v2565_v18 = vld [vmem:[#allocation8 + $0x380] sm:$0xf] }
 0x21c   :  { %v2300_v22 = vor.u32 %v3024_v47, %v2297_v16 }
 0x21e   :  { %1034 = vmatpush.bf16.msra.mxu3 %v2300_v22  ;;  %1059 = vmatpush.bf16.msrb.mxu1 %v2436_v28  ;;  %v2559_v28 = vld [vmem:[#allocation8 + $0x378] sm:$0xf0] }
 0x21f   :  { %v597_v5 = vpop.f32.mrf.mxu2  ;;  %v610_v6 = vpop.f32.mrf.mxu3  ;;  %v2562_v30 = vor.u32 %v3084_v27, %v2559_v28  ;;  %v2623_v27 = vld [vmem:[#allocation8 + $0x3f8] sm:$0xf0]  ;;  %v3116_v28 = vld [vmem:[#allocation8 + $0x474] sm:$0xf] }
 0x220   :  { %v2292_v6 = vor.u32 %v3022_v63, %v2289_v0  ;;  %v2621_v0 = vld [vmem:[#allocation8 + $0x3f0] sm:$0xf] }
 0x221   :  { %v2622_v3 = vor.u32 %v3101_v2, %v2621_v0  ;;  %v3078_v2 = vld [vmem:[#allocation8 + $0x344] sm:$0xf] }
 0x222   :  { %1035 = vmatpush.bf16.msra.mxu3 %v2292_v6  ;;  %1060 = vmatpush.bf16.msrb.mxu1 %v2428_v35  ;;  %v2613_v6 = vld [vmem:[#allocation8 + $0x3e0] sm:$0xf]  ;;  %v3077_v35 = vld [vmem:[#allocation8 + $0x334] sm:$0xf0] }
 0x223   :  { %v2614_v9 = vor.u32 %v3099_v8, %v2613_v6 }
 0x226   :  { %1405 = vmatpush.bf16.msrb.mxu3 %v2622_v3  ;;  %v2535_v3 = vld [vmem:[#allocation8 + $0x348] sm:$0xf0] }
 0x227   :  { %v647_v41 = vpop.f32.mrf.mxu2  ;;  %v660_v42 = vpop.f32.mrf.mxu3 }
 0x228   :  { %v648_v50 = vadd.f32 %v647_v41, %v635_v34  ;;  %v342_v34 = vperm.slane %v3481_v55, 0  ;;  %v2417_v41 = vld [vmem:[#allocation8 + $0x288] sm:$0xf0] }
 0x229   :  { %v2420_v46 = vor.u32 %v3054_v40, %v2417_v41  ;;  %v3093_v40 = vld [vmem:[#allocation8 + $0x3b4] sm:$0xf0]  ;;  %v3082_v41 = vld [vmem:[#allocation8 + $0x364] sm:$0xf] }
 0x22a   :  { %v661_v60 = vadd.f32 %v660_v42, %v648_v50  ;;  %v596_v44 = vadd.f32 %v3474_v37, %v342_v34  ;;  %1406 = vmatpush.bf16.msrb.mxu3 %v2614_v9  ;;  %v2525_v34 = vld [vmem:[#allocation8 + $0x330] sm:$0xf]  ;;  %v2590_v43 = vor.u32 %v3093_v40, %v2589_v36  ;;  %v3074_v36 = vld [vmem:[#allocation8 + $0x324] sm:$0xf] }
 0x22b   :  { %1061 = vmatpush.bf16.msrb.mxu1 %v2420_v46  ;;  %v2526_v39 = vor.u32 %v3077_v35, %v2525_v34  ;;  %v2690_v34 = vor.u32 %v3116_v28, %v2687_v31  ;;  %v3098_v40 = vld [vmem:[#allocation8 + $0x3e4] sm:$0xf]  ;;  %v2583_v28 = vld [vmem:[#allocation8 + $0x3a8] sm:$0xf0] }
 0x22c   :  { %v2283_v5 = vmul.f32 -1.442695, %v661_v60  ;;  %v609_v51 = vadd.f32 %v3476_v38, %v596_v44  ;;  %v2647_v31 = vld [vmem:[#allocation8 + $0x428] sm:$0xf0] }
 0x22e   :  { %3191 = vpow2.f32 %v2283_v5  ;;  %v622_v22 = vadd.f32 %v3470_v10, %v609_v51  ;;  %v3085_v10 = vld [vmem:[#allocation8 + $0x374] sm:$0xf0]  ;;  %v3083_v5 = vld [vmem:[#allocation8 + $0x364] sm:$0xf0]  ;;  %1407 = vmatpush.bf16.msrb.mxu3 %v2606_v17 }
 0x22f   :  { %v649_v11 = vpop.f32.mrf.mxu2  ;;  %v662_v12 = vpop.f32.mrf.mxu3  ;;  %v2550_v7 = vor.u32 %v3083_v5, %v2549_v4  ;;  %v3513_v4 = vld [vmem:[%s3571_s6 + $0x2] sm:$0x3]  ;;  %v3071_v17 = vld [vmem:[#allocation8 + $0x304] sm:$0xf0] }
 0x230   :  { %v2541_v11 = vld [vmem:[#allocation8 + $0x350] sm:$0xf]  ;;  %v3081_v12 = vld [vmem:[#allocation8 + $0x354] sm:$0xf0]  ;;  %v746_v8 = vperm.slane %v3513_v4, 1  ;;  %v2502_v19 = vor.u32 %v3071_v17, %v2501_v15 }
 0x231   :  { %v2542_v14 = vor.u32 %v3081_v12, %v2541_v11  ;;  %v2653_v12 = vld [vmem:[#allocation8 + $0x430] sm:$0xf] }
 0x234   :  { %v3192_v24 = vpop.eup %3191 }
 0x235   :  { %v667_v26 = vadd.f32 1.0, %v3192_v24  ;;  %v2597_v24 = vld [vmem:[#allocation8 + $0x3c0] sm:$0xf] }
 0x237   :  { %3193 = vrcp.f32 %v667_v26  ;;  %v679_v50 = vand.u32 2147483648, %v667_v26  ;;  %v677_v16 = vand.u32 2147483647, %v667_v26  ;;  %vm673_vm7 = vweird.f32 %v667_v26 }
 0x239   :  { %v680_v54 = vor.u32 1.1754944e-38, %v679_v50  ;;  %vm678_vm9 = vcmp.eq.f32.partialorder %v677_v16, 8.507059e+37  ;;  %v3113_v50 = vld [vmem:[#allocation8 + $0x454] sm:$0xf0]  ;;  %v3075_v16 = vld [vmem:[#allocation8 + $0x324] sm:$0xf0] }
 0x23d   :  { %v3194_v42 = vpop.eup %3193 }
 0x23e   :  { %v669_v45 = vmul.f32 %v3194_v42, %v667_v26  ;;  %vm674_vm6 = vweird.f32 %v3194_v42  ;;  %v3095_v26 = vld [vmem:[#allocation8 + $0x3c4] sm:$0xf0] }
 0x23f   :  { %vm675_vm8 = vmor %vm673_vm7, %vm674_vm6  ;;  %v2598_v29 = vor.u32 %v3095_v26, %v2597_v24  ;;  %v3100_v26 = vld [vmem:[#allocation8 + $0x3f4] sm:$0xf] }
 0x240   :  { %v670_v47 = vsub.f32 1.0, %v669_v45 }
 0x241   :  { %1408 = vmatpush.bf16.msrb.mxu3 %v2598_v29 }
 0x242   :  { %v671_v55 = vmul.f32 %v3194_v42, %v670_v47  ;;  %v2669_v47 = vld [vmem:[#allocation8 + $0x450] sm:$0xf] }
 0x243   :  { %v2670_v51 = vor.u32 %v3113_v50, %v2669_v47 }
 0x244   :  { %v672_v53 = vadd.f32 %v3194_v42, %v671_v55  ;;  %v2517_v55 = vld [vmem:[#allocation8 + $0x320] sm:$0xf] }
 0x245   :  { %1409 = vmatpush.bf16.msrb.mxu3 %v2590_v43  ;;  %v3114_v43 = vld [vmem:[#allocation8 + $0x464] sm:$0xf] }
 0x246   :  { %v676_v56 = vsel %vm675_vm8, %v3194_v42, %v672_v53  ;;  %v2551_v42 = vld [vmem:[#allocation8 + $0x368] sm:$0xf0]  ;;  %v2581_v53 = vld [vmem:[#allocation8 + $0x3a0] sm:$0xf] }
 0x247   :  { %v681_v37 = vsel %vm678_vm9, %v680_v54, %v676_v56  ;;  %v2554_v44 = vor.u32 %v3082_v41, %v2551_v42  ;;  %v2518_v54 = vor.u32 %v3075_v16, %v2517_v55  ;;  %v3080_v56 = vld [vmem:[#allocation8 + $0x354] sm:$0xf]  ;;  %v2615_v42 = vld [vmem:[#allocation8 + $0x3e8] sm:$0xf0]  ;;  %v2637_v16 = vld [vmem:[#allocation8 + $0x410] sm:$0xf] }
 0x248   :  { %v683_v57 = vmul.f32 %v681_v37, %v622_v22  ;;  %v3091_v22 = vld [vmem:[#allocation8 + $0x3a4] sm:$0xf0]  ;;  %v2543_v37 = vld [vmem:[#allocation8 + $0x358] sm:$0xf0] }
 0x24a   :  { %v684_v58 = vadd.f32 %v683_v57, %v3448_v48  ;;  %v2557_v48 = vld [vmem:[#allocation8 + $0x370] sm:$0xf]  ;;  %v2582_v57 = vor.u32 %v3091_v22, %v2581_v53  ;;  %v3105_v53 = vld [vmem:[#allocation8 + $0x414] sm:$0xf0] }
 0x24b   :  { %v2558_v1 = vor.u32 %v3085_v10, %v2557_v48  ;;  %v3073_v48 = vld [vmem:[#allocation8 + $0x314] sm:$0xf0]  ;;  %v2573_v10 = vld [vmem:[#allocation8 + $0x390] sm:$0xf] }
 0x24c   :  { %v3490_v59 = vmul.f32 0.70710677, %v684_v58  ;;  %v2546_v58 = vor.u32 %v3080_v56, %v2543_v37  ;;  %1410 = vmatpush.bf16.msrb.mxu3 %v2582_v57  ;;  %v2638_v37 = vor.u32 %v3105_v53, %v2637_v16  ;;  %v2511_v57 = vld [vmem:[#allocation8 + $0x318] sm:$0xf0] }
 0x24d   :  { %1392 = vmatpush.bf16.msrb.mxu2 %v2558_v1  ;;  %v3089_v1 = vld [vmem:[#allocation8 + $0x394] sm:$0xf0] }
 0x24e   :  { %v692_v38 = vpack.c.bf16 %v3490_v59, %v3490_v59  ;;  %v686_v60 = vrot.slane %v3490_v59, 6  ;;  %v688_v61 = vrot.slane %v3490_v59, 7  ;;  %v2574_v6 = vor.u32 %v3089_v1, %v2573_v10  ;;  %v2629_v10 = vld [vmem:[#allocation8 + $0x400] sm:$0xf]  ;;  %v3103_v1 = vld [vmem:[#allocation8 + $0x404] sm:$0xf0] }
 0x250   :  { %1023 = vmatmul.bf16.vlgmr.msra.gmra.mxu2 %v692_v38  ;;  %v2480_v62 = vpack.c.bf16 %v686_v60, %v686_v60  ;;  %v2485_v63 = vpack.c.bf16 %v688_v61, %v688_v61  ;;  %v2661_v60 = vld [vmem:[#allocation8 + $0x440] sm:$0xf]  ;;  %v3111_v61 = vld [vmem:[#allocation8 + $0x444] sm:$0xf0]  ;;  %1411 = vmatpush.bf16.msrb.mxu3 %v2574_v6 }
 0x251   :  { %1393 = vmatpush.bf16.msrb.mxu2 %v2550_v7  ;;  %v2538_v7 = vor.u32 %v3078_v2, %v2535_v3  ;;  %v3070_v2 = vld [vmem:[#allocation8 + $0x304] sm:$0xf]  ;;  %v2503_v3 = vld [vmem:[#allocation8 + $0x308] sm:$0xf0] }
 0x252   :  { %2481 = vmatmul.msk.bf16.vlgmr.msra.gmra.mxu0 %vm3450_vm4, %v2480_v62  ;;  %2486 = vmatmul.msk.bf16.vlgmr.msra.gmra.mxu1 %vm3458_vm5, %v2485_v63 }
 0x253   :  { %2491 = vmatmul.msk.bf16.vlgmr.msra.gmra.mxu3 %vm3450_vm4, %v2480_v62  ;;  %1418 = vmatpush.bf16.msra.mxu0 %v2686_v20  ;;  %v2662_v62 = vor.u32 %v3111_v61, %v2661_v60  ;;  %v3087_v20 = vld [vmem:[#allocation8 + $0x384] sm:$0xf0]  ;;  %v2607_v60 = vld [vmem:[#allocation8 + $0x3d8] sm:$0xf0] }
 0x254   :  { %1431 = vmatpush.bf16.msra.mxu1 %v2562_v30  ;;  %v2566_v24 = vor.u32 %v3087_v20, %v2565_v18  ;;  %v2626_v30 = vor.u32 %v3100_v26, %v2623_v27  ;;  %v3092_v20 = vld [vmem:[#allocation8 + $0x3b4] sm:$0xf]  ;;  %v3090_v27 = vld [vmem:[#allocation8 + $0x3a4] sm:$0xf] }
 0x255   :  { %1394 = vmatpush.bf16.msrb.mxu2 %v2542_v14  ;;  %v2654_v14 = vor.u32 %v3109_v13, %v2653_v12  ;;  %v2663_v12 = vld [vmem:[#allocation8 + $0x448] sm:$0xf0] }
 0x256   :  { %1412 = vmatpush.bf16.msrb.mxu3 %v2566_v24 }
 0x257   :  { %1419 = vmatpush.bf16.msra.mxu0 %v2678_v33  ;;  %v3107_v33 = vld [vmem:[#allocation8 + $0x424] sm:$0xf0] }
 0x258   :  { %1432 = vmatpush.bf16.msra.mxu1 %v2554_v44  ;;  %v2646_v35 = vor.u32 %v3107_v33, %v2645_v32  ;;  %v2679_v44 = vld [vmem:[#allocation8 + $0x468] sm:$0xf0]  ;;  %v2586_v33 = vor.u32 %v3090_v27, %v2583_v28  ;;  %v2747_v28 = vld [vmem:[#allocation8 + $0x4c0] sm:$0xf] }
 0x259   :  { %1395 = vmatpush.bf16.msrb.mxu2 %v2534_v25  ;;  %v2530_v25 = vor.u32 %v3076_v21, %v2527_v23  ;;  %v2682_v55 = vor.u32 %v3114_v43, %v2679_v44  ;;  %v2591_v21 = vld [vmem:[#allocation8 + $0x3b8] sm:$0xf0]  ;;  %v3108_v23 = vld [vmem:[#allocation8 + $0x434] sm:$0xf]  ;;  %v3086_v44 = vld [vmem:[#allocation8 + $0x384] sm:$0xf] }
 0x25a   :  { %1457 = vmatpush.bf16.msra.mxu3 %v2690_v34  ;;  %v2594_v24 = vor.u32 %v3092_v20, %v2591_v21  ;;  %v2819_v20 = vld [vmem:[#allocation8 + $0x550] sm:$0xf] }
 0x25b   :  { %1420 = vmatpush.bf16.msra.mxu0 %v2670_v51  ;;  %v2618_v51 = vor.u32 %v3098_v40, %v2615_v42  ;;  %v2639_v40 = vld [vmem:[#allocation8 + $0x418] sm:$0xf0]  ;;  %v745_v42 = vperm.slane %v3513_v4, 0 }
 0x25c   :  { %1433 = vmatpush.bf16.msra.mxu1 %v2546_v58  ;;  %v3096_v58 = vld [vmem:[#allocation8 + $0x3d4] sm:$0xf] }
 0x25d   :  { %1396 = vmatpush.bf16.msrb.mxu2 %v2526_v39  ;;  %v2519_v39 = vld [vmem:[#allocation8 + $0x328] sm:$0xf0] }
 0x25e   :  { %v2522_v41 = vor.u32 %v3074_v36, %v2519_v39  ;;  %1458 = vmatpush.bf16.msra.mxu3 %v2682_v55  ;;  %v2575_v36 = vld [vmem:[#allocation8 + $0x398] sm:$0xf0]  ;;  %v3104_v39 = vld [vmem:[#allocation8 + $0x414] sm:$0xf] }
 0x25f   :  { %1421 = vmatpush.bf16.msra.mxu0 %v2662_v62  ;;  %v2642_v43 = vor.u32 %v3104_v39, %v2639_v40  ;;  %v2891_v40 = vld [vmem:[#allocation8 + $0x5e0] sm:$0xf] }
 0x260   :  { %1434 = vmatpush.bf16.msra.mxu1 %v2538_v7  ;;  %v2630_v7 = vor.u32 %v3103_v1, %v2629_v10 }
 0x261   :  { %1397 = vmatpush.bf16.msrb.mxu2 %v2518_v54  ;;  %v3072_v54 = vld [vmem:[#allocation8 + $0x314] sm:$0xf] }
 0x262   :  { %2496 = vmatmul.msk.bf16.vlgmr.msrb.gmra.mxu0 %vm3458_vm5, %v2485_v63  ;;  %1062 = vmatmul.bf16.vlgmr.msrb.gmra.mxu1 %v692_v38  ;;  %v2509_v63 = vld [vmem:[#allocation8 + $0x310] sm:$0xf]  ;;  %v2514_v62 = vor.u32 %v3072_v54, %v2511_v57 }
 0x263   :  { %v2510_v0 = vor.u32 %v3073_v48, %v2509_v63  ;;  %1422 = vmatpush.bf16.msra.mxu0 %v2654_v14  ;;  %v3112_v63 = vld [vmem:[#allocation8 + $0x454] sm:$0xf]  ;;  %v2671_v48 = vld [vmem:[#allocation8 + $0x458] sm:$0xf0]  ;;  %v2506_v14 = vor.u32 %v3070_v2, %v2503_v3 }
 0x264   :  { %1435 = vmatpush.bf16.msra.mxu1 %v2530_v25  ;;  %v2674_v6 = vor.u32 %v3112_v63, %v2671_v48  ;;  %v2655_v25 = vld [vmem:[#allocation8 + $0x438] sm:$0xf0] }
 0x265   :  { %1398 = vmatpush.bf16.msrb.mxu2 %v2510_v0  ;;  %v2610_v0 = vor.u32 %v3096_v58, %v2607_v60  ;;  %v2658_v26 = vor.u32 %v3108_v23, %v2655_v25  ;;  %v3145_v23 = vld [vmem:[#allocation8 + $0x554] sm:$0xf0]  ;;  %v2899_v25 = vld [vmem:[#allocation8 + $0x5f0] sm:$0xf] }
 0x266   :  { %1459 = vmatpush.bf16.msra.mxu3 %v2674_v6  ;;  %v2835_v6 = vld [vmem:[#allocation8 + $0x570] sm:$0xf] }
 0x267   :  { %1423 = vmatpush.bf16.msra.mxu0 %v2646_v35  ;;  %v3088_v35 = vld [vmem:[#allocation8 + $0x394] sm:$0xf] }
 0x268   :  { %1436 = vmatpush.bf16.msra.mxu1 %v2522_v41  ;;  %v2578_v41 = vor.u32 %v3088_v35, %v2575_v36 }
 0x269   :  { %1399 = vmatpush.bf16.msrb.mxu2 %v2502_v19 }
 0x26b   :  { %1424 = vmatpush.bf16.msra.mxu0 %v2638_v37 }
 0x26c   :  { %1437 = vmatpush.bf16.msra.mxu1 %v2514_v62 }
 0x26d   :  { %1444 = vmatpush.bf16.msra.mxu2 %v2626_v30 }
 0x26f   :  { %1425 = vmatpush.bf16.msra.mxu0 %v2630_v7 }
 0x270   :  { %1438 = vmatpush.bf16.msra.mxu1 %v2506_v14  ;;  %v3147_v14 = vld [vmem:[#allocation8 + $0x564] sm:$0xf0] }
 0x271   :  { %1445 = vmatpush.bf16.msra.mxu2 %v2618_v51  ;;  %v2631_v51 = vld [vmem:[#allocation8 + $0x408] sm:$0xf0] }
 0x275   :  { %1446 = vmatpush.bf16.msra.mxu2 %v2610_v0 }
 0x2cf   :  { %v3504_v45 = vpop.f32.mrf.mxu0  ;;  %v3506_v46 = vpop.f32.mrf.mxu1 }
 0x2d0   :  { %v999_v53 = vadd.f32 %v3504_v45, %v745_v42 }
 0x2d2   :  { %v1012_v57 = vadd.f32 %v3506_v46, %v999_v53 }
 0x2d3   :  { %v3508_v38 = vpop.f32.mrf.mxu2 }
 0x2d4   :  { %v1025_v62 = vadd.f32 %v3508_v38, %v1012_v57  ;;  %v3133_v38 = vld [vmem:[#allocation8 + $0x4f4] sm:$0xf0] }
 0x2d6   :  { %v1037_v5 = vpop.f32.mrf.mxu3 }
 0x2d7   :  { %v1000_v9 = vpop.f32.mrf.mxu0  ;;  %v1013_v11 = vpop.f32.mrf.mxu1  ;;  %v1038_v47 = vadd.f32 %v1037_v5, %v746_v8  ;;  %v3094_v8 = vld [vmem:[#allocation8 + $0x3c4] sm:$0xf] }
 0x2d8   :  { %v2599_v9 = vld [vmem:[#allocation8 + $0x3c8] sm:$0xf0]  ;;  %v3110_v11 = vld [vmem:[#allocation8 + $0x444] sm:$0xf] }
 0x2d9   :  { %v2602_v15 = vor.u32 %v3094_v8, %v2599_v9  ;;  %v2666_v17 = vor.u32 %v3110_v11, %v2663_v12  ;;  %v3149_v8 = vld [vmem:[#allocation8 + $0x574] sm:$0xf0]  ;;  %v2763_v9 = vld [vmem:[#allocation8 + $0x4e0] sm:$0xf]  ;;  %v3131_v11 = vld [vmem:[#allocation8 + $0x4e4] sm:$0xf0] }
 0x2da   :  { %v2836_v12 = vor.u32 %v3149_v8, %v2835_v6  ;;  %v2787_v6 = vld [vmem:[#allocation8 + $0x510] sm:$0xf]  ;;  %v3137_v8 = vld [vmem:[#allocation8 + $0x514] sm:$0xf0] }
 0x2db   :  { %v1026_v29 = vpop.f32.mrf.mxu2  ;;  %1447 = vmatpush.bf16.msra.mxu2 %v2602_v15  ;;  %1460 = vmatpush.bf16.msra.mxu3 %v2666_v17  ;;  %v2764_v15 = vor.u32 %v3131_v11, %v2763_v9  ;;  %v3126_v9 = vld [vmem:[#allocation8 + $0x4c4] sm:$0xf]  ;;  %v2749_v11 = vld [vmem:[#allocation8 + $0x4c8] sm:$0xf0] }
 0x2dc   :  { %v3106_v29 = vld [vmem:[#allocation8 + $0x424] sm:$0xf]  ;;  %1806 = vmatpush.bf16.msrb.mxu1 %v2836_v12 }
 0x2dd   :  { %v2650_v34 = vor.u32 %v3106_v29, %v2647_v31  ;;  %v3127_v29 = vld [vmem:[#allocation8 + $0x4c4] sm:$0xf0] }
 0x2de   :  { %v1039_v50 = vpop.f32.mrf.mxu3  ;;  %v2748_v31 = vor.u32 %v3127_v29, %v2747_v28 }
 0x2df   :  { %v1050_v22 = vpop.f32.mrf.mxu0  ;;  %v1063_v56 = vpop.f32.mrf.mxu1  ;;  %1448 = vmatpush.bf16.msra.mxu2 %v2594_v24  ;;  %1461 = vmatpush.bf16.msra.mxu3 %v2658_v26  ;;  %v3102_v50 = vld [vmem:[#allocation8 + $0x404] sm:$0xf]  ;;  %v2820_v24 = vor.u32 %v3145_v23, %v2819_v20  ;;  %v3165_v26 = vld [vmem:[#allocation8 + $0x5f4] sm:$0xf0]  ;;  %v2715_v20 = vld [vmem:[#allocation8 + $0x480] sm:$0xf] }
 0x2e0   :  { %v1051_v61 = vadd.f32 %v1050_v22, %v1038_v47  ;;  %v2567_v47 = vld [vmem:[#allocation8 + $0x388] sm:$0xf0]  ;;  %v2634_v22 = vor.u32 %v3102_v50, %v2631_v51  ;;  %v2900_v27 = vor.u32 %v3165_v26, %v2899_v25  ;;  %v3141_v51 = vld [vmem:[#allocation8 + $0x534] sm:$0xf0]  ;;  %v2779_v23 = vld [vmem:[#allocation8 + $0x500] sm:$0xf] }
 0x2e1   :  { %v2570_v16 = vor.u32 %v3086_v44, %v2567_v47  ;;  %v3125_v44 = vld [vmem:[#allocation8 + $0x4b4] sm:$0xf0]  ;;  %v2803_v47 = vld [vmem:[#allocation8 + $0x530] sm:$0xf]  ;;  %v3135_v25 = vld [vmem:[#allocation8 + $0x504] sm:$0xf0] }
 0x2e2   :  { %v1064_v5 = vadd.f32 %v1063_v56, %v1051_v61  ;;  %v3124_v26 = vld [vmem:[#allocation8 + $0x4b4] sm:$0xf]  ;;  %v2780_v28 = vor.u32 %v3135_v25, %v2779_v23 }
 0x2e3   :  { %1449 = vmatpush.bf16.msra.mxu2 %v2586_v33  ;;  %1462 = vmatpush.bf16.msra.mxu3 %v2650_v34  ;;  %v3132_v33 = vld [vmem:[#allocation8 + $0x4f4] sm:$0xf]  ;;  %v2773_v34 = vld [vmem:[#allocation8 + $0x4f8] sm:$0xf0] }
 0x2e4   :  { %v2497_v13 = vmul.f32 -1.442695, %v1064_v5  ;;  %v2776_v36 = vor.u32 %v3132_v33, %v2773_v34  ;;  %v3140_v23 = vld [vmem:[#allocation8 + $0x534] sm:$0xf] }
 0x2e5   :  { %v3156_v25 = vld [vmem:[#allocation8 + $0x5b4] sm:$0xf] }
 0x2e6   :  { %3195 = vpow2.f32 %v2497_v13  ;;  %v2827_v13 = vld [vmem:[#allocation8 + $0x560] sm:$0xf] }
 0x2e7   :  { %v1052_v18 = vpop.f32.mrf.mxu0  ;;  %v1065_v19 = vpop.f32.mrf.mxu1  ;;  %1450 = vmatpush.bf16.msra.mxu2 %v2578_v41  ;;  %1463 = vmatpush.bf16.msra.mxu3 %v2642_v43  ;;  %v2828_v17 = vor.u32 %v3147_v14, %v2827_v13  ;;  %v3163_v41 = vld [vmem:[#allocation8 + $0x5e4] sm:$0xf0]  ;;  %v2739_v43 = vld [vmem:[#allocation8 + $0x4b0] sm:$0xf]  ;;  %v2788_v13 = vor.u32 %v3137_v8, %v2787_v6  ;;  %v2752_v14 = vor.u32 %v3126_v9, %v2749_v11  ;;  %v2717_v6 = vld [vmem:[#allocation8 + $0x488] sm:$0xf0] }
 0x2e8   :  { %v2755_v18 = vld [vmem:[#allocation8 + $0x4d0] sm:$0xf]  ;;  %v3129_v19 = vld [vmem:[#allocation8 + $0x4d4] sm:$0xf0]  ;;  %v2892_v42 = vor.u32 %v3163_v41, %v2891_v40  ;;  %v2740_v50 = vor.u32 %v3125_v44, %v2739_v43  ;;  %v2859_v40 = vld [vmem:[#allocation8 + $0x5a0] sm:$0xf] }
 0x2e9   :  { %1807 = vmatpush.bf16.msrb.mxu1 %v2828_v17  ;;  %v2756_v21 = vor.u32 %v3129_v19, %v2755_v18  ;;  %v2867_v17 = vld [vmem:[#allocation8 + $0x5b0] sm:$0xf]  ;;  %v3157_v18 = vld [vmem:[#allocation8 + $0x5b4] sm:$0xf0]  ;;  %v3155_v41 = vld [vmem:[#allocation8 + $0x5a4] sm:$0xf0] }
 0x2ea   :  { %v2868_v19 = vor.u32 %v3157_v18, %v2867_v17  ;;  %v2860_v44 = vor.u32 %v3155_v41, %v2859_v40  ;;  %v3142_v11 = vld [vmem:[#allocation8 + $0x544] sm:$0xf]  ;;  %v2877_v18 = vld [vmem:[#allocation8 + $0x5c8] sm:$0xf0]  ;;  %v3136_v40 = vld [vmem:[#allocation8 + $0x514] sm:$0xf] }
 0x2eb   :  { %1451 = vmatpush.bf16.msra.mxu2 %v2570_v16  ;;  %1464 = vmatpush.bf16.msra.mxu3 %v2634_v22  ;;  %v2765_v16 = vld [vmem:[#allocation8 + $0x4e8] sm:$0xf0]  ;;  %v2789_v41 = vld [vmem:[#allocation8 + $0x518] sm:$0xf0] }
 0x2ec   :  { %v3196_v30 = vpop.eup %3195 }
 0x2ed   :  { %v1070_v32 = vadd.f32 1.0, %v3196_v30  ;;  %1808 = vmatpush.bf16.msrb.mxu1 %v2820_v24  ;;  %v2811_v30 = vld [vmem:[#allocation8 + $0x540] sm:$0xf] }
 0x2ef   :  { %3197 = vrcp.f32 %v1070_v32  ;;  %v1082_v37 = vand.u32 2147483648, %v1070_v32  ;;  %v1080_v58 = vand.u32 2147483647, %v1070_v32  ;;  %vm1076_vm11 = vweird.f32 %v1070_v32 }
 0x2f1   :  { %v1083_v61 = vor.u32 1.1754944e-38, %v1082_v37  ;;  %vm1081_vm13 = vcmp.eq.f32.partialorder %v1080_v58, 8.507059e+37  ;;  %v3161_v37 = vld [vmem:[#allocation8 + $0x5d4] sm:$0xf0]  ;;  %v3123_v58 = vld [vmem:[#allocation8 + $0x4a4] sm:$0xf0] }
 0x2f5   :  { %v3198_v55 = vpop.eup %3197 }
 0x2f6   :  { %v1072_v54 = vmul.f32 %v3198_v55, %v1070_v32  ;;  %vm1077_vm10 = vweird.f32 %v3198_v55  ;;  %v3143_v32 = vld [vmem:[#allocation8 + $0x544] sm:$0xf0] }
 0x2f7   :  { %vm1078_vm12 = vmor %vm1076_vm11, %vm1077_vm10  ;;  %v2812_v35 = vor.u32 %v3143_v32, %v2811_v30  ;;  %v3148_v30 = vld [vmem:[#allocation8 + $0x574] sm:$0xf] }
 0x2f8   :  { %v1073_v56 = vsub.f32 1.0, %v1072_v54  ;;  %v2804_v54 = vor.u32 %v3141_v51, %v2803_v47  ;;  %v3164_v32 = vld [vmem:[#allocation8 + $0x5f4] sm:$0xf]  ;;  %v3122_v47 = vld [vmem:[#allocation8 + $0x4a4] sm:$0xf] }
 0x2f9   :  { %1809 = vmatpush.bf16.msrb.mxu1 %v2812_v35  ;;  %v3146_v51 = vld [vmem:[#allocation8 + $0x564] sm:$0xf] }
 0x2fa   :  { %v1074_v4 = vmul.f32 %v3198_v55, %v1073_v56  ;;  %v2883_v56 = vld [vmem:[#allocation8 + $0x5d0] sm:$0xf] }
 0x2fb   :  { %v2884_v57 = vor.u32 %v3161_v37, %v2883_v56 }
 0x2fc   :  { %v1075_v60 = vadd.f32 %v3198_v55, %v1074_v4  ;;  %v2731_v4 = vld [vmem:[#allocation8 + $0x4a0] sm:$0xf] }
 0x2fd   :  { %1810 = vmatpush.bf16.msrb.mxu1 %v2804_v54  ;;  %v3162_v54 = vld [vmem:[#allocation8 + $0x5e4] sm:$0xf] }
 0x2fe   :  { %v1079_v45 = vsel %vm1078_vm12, %v3198_v55, %v1075_v60  ;;  %v3130_v55 = vld [vmem:[#allocation8 + $0x4e4] sm:$0xf]  ;;  %v2795_v60 = vld [vmem:[#allocation8 + $0x520] sm:$0xf] }
 0x2ff   :  { %v1084_v63 = vsel %vm1081_vm13, %v1083_v61, %v1079_v45  ;;  %v2768_v22 = vor.u32 %v3130_v55, %v2765_v16  ;;  %v2732_v61 = vor.u32 %v3123_v58, %v2731_v4  ;;  %v3128_v45 = vld [vmem:[#allocation8 + $0x4d4] sm:$0xf]  ;;  %v2829_v16 = vld [vmem:[#allocation8 + $0x568] sm:$0xf0]  ;;  %v3153_v4 = vld [vmem:[#allocation8 + $0x594] sm:$0xf0] }
 0x300   :  { %v1086_v48 = vmul.f32 %v1084_v63, %v1025_v62  ;;  %v3139_v62 = vld [vmem:[#allocation8 + $0x524] sm:$0xf0]  ;;  %v2757_v63 = vld [vmem:[#allocation8 + $0x4d8] sm:$0xf0]  ;;  %v2832_v56 = vor.u32 %v3146_v51, %v2829_v16  ;;  %v3120_v58 = vld [vmem:[#allocation8 + $0x494] sm:$0xf] }
 0x301   :  { %v2781_v16 = vld [vmem:[#allocation8 + $0x508] sm:$0xf0] }
 0x302   :  { %v1087_v10 = vadd.f32 %v1086_v48, %v3490_v59  ;;  %v2771_v59 = vld [vmem:[#allocation8 + $0x4f0] sm:$0xf]  ;;  %v2796_v48 = vor.u32 %v3139_v62, %v2795_v60  ;;  %v3144_v62 = vld [vmem:[#allocation8 + $0x554] sm:$0xf] }
 0x303   :  { %v2772_v7 = vor.u32 %v3133_v38, %v2771_v59  ;;  %v2723_v59 = vld [vmem:[#allocation8 + $0x490] sm:$0xf]  ;;  %v3121_v38 = vld [vmem:[#allocation8 + $0x494] sm:$0xf0] }
 0x304   :  { %v1088_v0 = vmul.f32 0.70710677, %v1087_v10  ;;  %v2760_v10 = vor.u32 %v3128_v45, %v2757_v63  ;;  %1811 = vmatpush.bf16.msrb.mxu1 %v2796_v48  ;;  %v2821_v45 = vld [vmem:[#allocation8 + $0x558] sm:$0xf0] }
 0x305   :  { %1793 = vmatpush.bf16.msrb.mxu0 %v2772_v7  ;;  %v2724_v7 = vor.u32 %v3121_v38, %v2723_v59  ;;  %v2824_v48 = vor.u32 %v3144_v62, %v2821_v45  ;;  %v3151_v59 = vld [vmem:[#allocation8 + $0x584] sm:$0xf0]  ;;  %v3118_v38 = vld [vmem:[#allocation8 + $0x484] sm:$0xf] }
 0x306   :  { %v1095_v1 = vpack.c.bf16 %v1088_v0, %v1088_v0  ;;  %v1089_v2 = vrot.slane %v1088_v0, 6  ;;  %v1091_v46 = vrot.slane %v1088_v0, 7  ;;  %v2720_v17 = vor.u32 %v3118_v38, %v2717_v6 }
 0x308   :  { %1426 = vmatmul.bf16.vlgmr.msra.gmra.mxu0 %v1095_v1  ;;  %v2694_v3 = vpack.c.bf16 %v1089_v2, %v1089_v2  ;;  %v2699_v5 = vpack.c.bf16 %v1091_v46, %v1091_v46  ;;  %v2875_v2 = vld [vmem:[#allocation8 + $0x5c0] sm:$0xf]  ;;  %v3159_v46 = vld [vmem:[#allocation8 + $0x5c4] sm:$0xf0]  ;;  %1812 = vmatpush.bf16.msrb.mxu1 %v2788_v13  ;;  %v3158_v13 = vld [vmem:[#allocation8 + $0x5c4] sm:$0xf] }
 0x309   :  { %1794 = vmatpush.bf16.msrb.mxu0 %v2764_v15  ;;  %v3540_v15 = vld [vmem:[%s3571_s6 + $0x4] sm:$0x3] }
 0x30a   :  { %2695 = vmatmul.msk.bf16.vlgmr.msrb.gmra.mxu2 %vm3450_vm4, %v2694_v3  ;;  %2700 = vmatmul.msk.bf16.vlgmr.msrb.gmra.mxu3 %vm3458_vm5, %v2699_v5 }
 0x30b   :  { %2705 = vmatmul.msk.bf16.vlgmr.msra.gmra.mxu1 %vm3450_vm4, %v2694_v3  ;;  %1819 = vmatpush.bf16.msrb.mxu2 %v2900_v27  ;;  %v2741_v27 = vld [vmem:[#allocation8 + $0x4b8] sm:$0xf0] }
 0x30c   :  { %1832 = vmatpush.bf16.msrb.mxu3 %v2776_v36  ;;  %v2744_v29 = vor.u32 %v3124_v26, %v2741_v27  ;;  %v2901_v36 = vld [vmem:[#allocation8 + $0x5f8] sm:$0xf0]  ;;  %1813 = vmatpush.bf16.msrb.mxu1 %v2780_v28 }
 0x30d   :  { %1795 = vmatpush.bf16.msrb.mxu0 %v2756_v21  ;;  %v3119_v21 = vld [vmem:[#allocation8 + $0x484] sm:$0xf0]  ;;  %v2904_v43 = vor.u32 %v3164_v32, %v2901_v36  ;;  %v2869_v27 = vld [vmem:[#allocation8 + $0x5b8] sm:$0xf0]  ;;  %v2797_v32 = vld [vmem:[#allocation8 + $0x528] sm:$0xf0] }
 0x30e   :  { %v2716_v24 = vor.u32 %v3119_v21, %v2715_v20 }
 0x30f   :  { %1820 = vmatpush.bf16.msrb.mxu2 %v2892_v42  ;;  %v1149_v42 = vperm.slane %v3540_v15, 1 }
 0x310   :  { %1833 = vmatpush.bf16.msrb.mxu3 %v2768_v22  ;;  %1858 = vmatpush.bf16.msra.mxu1 %v2904_v43  ;;  %v2893_v22 = vld [vmem:[#allocation8 + $0x5e8] sm:$0xf0]  ;;  %v2853_v43 = vld [vmem:[#allocation8 + $0x598] sm:$0xf0] }
 0x311   :  { %1796 = vmatpush.bf16.msrb.mxu0 %v2748_v31  ;;  %v2837_v31 = vld [vmem:[#allocation8 + $0x578] sm:$0xf0]  ;;  %v2896_v37 = vor.u32 %v3162_v54, %v2893_v22  ;;  %v3150_v54 = vld [vmem:[#allocation8 + $0x584] sm:$0xf]  ;;  %v2845_v22 = vld [vmem:[#allocation8 + $0x588] sm:$0xf0] }
 0x312   :  { %v2840_v35 = vor.u32 %v3148_v30, %v2837_v31  ;;  %v2872_v30 = vor.u32 %v3156_v25, %v2869_v27  ;;  %v3138_v31 = vld [vmem:[#allocation8 + $0x524] sm:$0xf] }
 0x313   :  { %1821 = vmatpush.bf16.msrb.mxu2 %v2884_v57  ;;  %v2851_v57 = vld [vmem:[#allocation8 + $0x590] sm:$0xf]  ;;  %v3166_v25 = vld [vmem:[#allocation10] sm:$0xff] }
 0x314   :  { %1834 = vmatpush.bf16.msrb.mxu3 %v2760_v10  ;;  %v2852_v60 = vor.u32 %v3153_v4, %v2851_v57  ;;  %v3160_v10 = vld [vmem:[#allocation8 + $0x5d4] sm:$0xf]  ;;  %1859 = vmatpush.bf16.msra.mxu1 %v2896_v37  ;;  %v1148_v37 = vperm.slane %v3540_v15, 0  ;;  %v2848_v57 = vor.u32 %v3150_v54, %v2845_v22 }
 0x315   :  { %1797 = vmatpush.bf16.msrb.mxu0 %v2740_v50  ;;  %v2733_v50 = vld [vmem:[#allocation8 + $0x4a8] sm:$0xf0] }
 0x316   :  { %v2736_v55 = vor.u32 %v3122_v47, %v2733_v50  ;;  %v2792_v50 = vor.u32 %v3136_v40, %v2789_v41 }
 0x318   :  { %1835 = vmatpush.bf16.msrb.mxu3 %v2752_v14 }
 0x319   :  { %1798 = vmatpush.bf16.msrb.mxu0 %v2732_v61  ;;  %v2725_v61 = vld [vmem:[#allocation8 + $0x498] sm:$0xf0] }
 0x31a   :  { %2710 = vmatmul.msk.bf16.vlgmr.msra.gmra.mxu2 %vm3458_vm5, %v2699_v5  ;;  %1465 = vmatmul.bf16.vlgmr.msra.gmra.mxu3 %v1095_v1  ;;  %v2876_v5 = vor.u32 %v3159_v46, %v2875_v2  ;;  %v2728_v63 = vor.u32 %v3120_v58, %v2725_v61  ;;  %v2885_v2 = vld [vmem:[#allocation8 + $0x5d8] sm:$0xf0]  ;;  %v2843_v46 = vld [vmem:[#allocation8 + $0x580] sm:$0xf] }
 0x31b   :  { %v2844_v9 = vor.u32 %v3151_v59, %v2843_v46 }
 0x31c   :  { %1822 = vmatpush.bf16.msrb.mxu2 %v2876_v5  ;;  %1836 = vmatpush.bf16.msrb.mxu3 %v2744_v29  ;;  %v2888_v5 = vor.u32 %v3160_v10, %v2885_v2 }
 0x31d   :  { %1799 = vmatpush.bf16.msrb.mxu0 %v2724_v7 }
 0x31e   :  { %1860 = vmatpush.bf16.msra.mxu1 %v2888_v5 }
 0x320   :  { %1823 = vmatpush.bf16.msrb.mxu2 %v2868_v19  ;;  %1837 = vmatpush.bf16.msrb.mxu3 %v2736_v55  ;;  %v3134_v55 = vld [vmem:[#allocation8 + $0x504] sm:$0xf] }
 0x321   :  { %1800 = vmatpush.bf16.msrb.mxu0 %v2716_v24  ;;  %v2805_v24 = vld [vmem:[#allocation8 + $0x538] sm:$0xf0] }
 0x322   :  { %v2808_v26 = vor.u32 %v3140_v23, %v2805_v24 }
 0x324   :  { %1824 = vmatpush.bf16.msrb.mxu2 %v2860_v44  ;;  %1838 = vmatpush.bf16.msrb.mxu3 %v2728_v63 }
 0x325   :  { %1845 = vmatpush.bf16.msra.mxu0 %v2840_v35  ;;  %v2800_v35 = vor.u32 %v3138_v31, %v2797_v32 }
 0x328   :  { %1825 = vmatpush.bf16.msrb.mxu2 %v2852_v60  ;;  %1839 = vmatpush.bf16.msrb.mxu3 %v2720_v17 }
 0x329   :  { %1846 = vmatpush.bf16.msra.mxu0 %v2832_v56  ;;  %v2784_v56 = vor.u32 %v3134_v55, %v2781_v16 }
 0x32c   :  { %1826 = vmatpush.bf16.msrb.mxu2 %v2844_v9 }
 0x32d   :  { %1847 = vmatpush.bf16.msra.mxu0 %v2824_v48 }
 0x385   :  { %v3529_v39 = vpop.f32.mrf.mxu0 }
 0x388   :  { %v3531_v53 = vpop.f32.mrf.mxu1 }
 0x38d   :  { %v3533_v0 = vpop.f32.mrf.mxu2  ;;  %v3535_v1 = vpop.f32.mrf.mxu3 }
 0x38e   :  { %v1429_v3 = vpop.f32.mrf.mxu0  ;;  %v1402_v58 = vadd.f32 %v3533_v0, %v1148_v37 }
 0x38f   :  { %v1441_v3 = vadd.f32 %v3531_v53, %v1149_v42  ;;  %v2880_v53 = vor.u32 %v3158_v13, %v2877_v18  ;;  %v3152_v42 = vld [vmem:[#allocation8 + $0x594] sm:$0xf] }
 0x390   :  { %v1442_v12 = vpop.f32.mrf.mxu1  ;;  %v2856_v51 = vor.u32 %v3152_v42, %v2853_v43  ;;  %v1415_v45 = vadd.f32 %v3535_v1, %v1402_v58  ;;  %v3172_v1 = vld [vmem:[#allocation10 + $0x30] sm:$0xff] }
 0x391   :  { %v2813_v12 = vld [vmem:[#allocation8 + $0x548] sm:$0xf0]  ;;  %1861 = vmatpush.bf16.msra.mxu1 %v2880_v53 }
 0x392   :  { %v2816_v19 = vor.u32 %v3142_v11, %v2813_v12  ;;  %v1428_v15 = vadd.f32 %v3529_v39, %v1415_v45  ;;  %v3173_v39 = vld [vmem:[#allocation10 + $0x38] sm:$0xff]  ;;  %v3170_v12 = vld [vmem:[#allocation10 + $0x20] sm:$0xff]  ;;  %v3167_v53 = vld [vmem:[#allocation10 + $0x8] sm:$0xff] }
 0x393   :  { %1960 = vmatpush.bf16.msra.mxu2 %v3173_v39 }
 0x394   :  { %1848 = vmatpush.bf16.msra.mxu0 %v2816_v19  ;;  %v3168_v19 = vld [vmem:[#allocation10 + $0x10] sm:$0xff] }
 0x395   :  { %v1403_v33 = vpop.f32.mrf.mxu2  ;;  %v1416_v34 = vpop.f32.mrf.mxu3  ;;  %1862 = vmatpush.bf16.msra.mxu1 %v2872_v30 }
 0x396   :  { %v3154_v33 = vld [vmem:[#allocation8 + $0x5a4] sm:$0xf]  ;;  %v2861_v34 = vld [vmem:[#allocation8 + $0x5a8] sm:$0xf0] }
 0x397   :  { %v2864_v36 = vor.u32 %v3154_v33, %v2861_v34  ;;  %1961 = vmatpush.bf16.msra.mxu2 %v3172_v1 }
 0x398   :  { %1849 = vmatpush.bf16.msra.mxu0 %v2808_v26 }
 0x399   :  { %1863 = vmatpush.bf16.msra.mxu1 %v2864_v36 }
 0x39c   :  { %1850 = vmatpush.bf16.msra.mxu0 %v2800_v35  ;;  %v1549_v35 = vperm.slane %v2712_v52, 0 }
 0x39d   :  { %v1453_v7 = vpop.f32.mrf.mxu2  ;;  %v1466_v8 = vpop.f32.mrf.mxu3  ;;  %1864 = vmatpush.bf16.msra.mxu1 %v2856_v51 }
 0x39e   :  { %v1454_v14 = vadd.f32 %v1453_v7, %v1441_v3 }
 0x3a0   :  { %v1467_v20 = vadd.f32 %v1466_v8, %v1454_v14  ;;  %1851 = vmatpush.bf16.msra.mxu0 %v2792_v50  ;;  %v3171_v8 = vld [vmem:[#allocation10 + $0x28] sm:$0xff]  ;;  %v3169_v14 = vld [vmem:[#allocation10 + $0x18] sm:$0xff] }
 0x3a1   :  { %1865 = vmatpush.bf16.msra.mxu1 %v2848_v57  ;;  %1962 = vmatpush.bf16.msra.mxu2 %v3171_v8  ;;  %v3190_v57 = vld [vmem:[%s3573_s8] ss:$0 sm:$0xff]  ;;  %s1992_s8 = sshll.u32 %s3574_s9, 4  ;;  %s1993_s8 = int_to_ptr.hbm [resolvable:$true] %s1992_s8 }
 0x3a2   :  { %v2711_v21 = vmul.f32 -1.442695, %v1467_v20  ;;  %v1550_v20 = vperm.slane %v2712_v52, 1 }
 0x3a4   :  { %3199 = vpow2.f32 %v2711_v21  ;;  %1852 = vmatpush.bf16.msra.mxu0 %v2784_v56 }
 0x3a5   :  { %v1455_v28 = vpop.f32.mrf.mxu2  ;;  %v1468_v29 = vpop.f32.mrf.mxu3  ;;  %1963 = vmatpush.bf16.msra.mxu2 %v3170_v12 }
 0x3a9   :  { %1964 = vmatpush.bf16.msra.mxu2 %v3169_v14 }
 0x3aa   :  { %v3200_v44 = vpop.eup %3199 }
 0x3ab   :  { %v1473_v47 = vadd.f32 1.0, %v3200_v44 }
 0x3ad   :  { %3201 = vrcp.f32 %v1473_v47  ;;  %v1485_v62 = vand.u32 2147483648, %v1473_v47  ;;  %v1483_v48 = vand.u32 2147483647, %v1473_v47  ;;  %vm1479_vm15 = vweird.f32 %v1473_v47  ;;  %1965 = vmatpush.bf16.msra.mxu2 %v3168_v19 }
 0x3af   :  { %v1486_v2 = vor.u32 1.1754944e-38, %v1485_v62  ;;  %vm1484_vm1 = vcmp.eq.f32.partialorder %v1483_v48, 8.507059e+37 }
 0x3b1   :  { %1966 = vmatpush.bf16.msra.mxu2 %v3167_v53 }
 0x3b3   :  { %v3202_v4 = vpop.eup %3201 }
 0x3b4   :  { %v1475_v60 = vmul.f32 %v3202_v4, %v1473_v47  ;;  %vm1480_vm14 = vweird.f32 %v3202_v4 }
 0x3b5   :  { %vm1481_vm0 = vmor %vm1479_vm15, %vm1480_vm14  ;;  %1967 = vmatpush.bf16.msra.mxu2 %v3166_v25 }
 0x3b6   :  { %v1476_v61 = vsub.f32 1.0, %v1475_v60 }
 0x3b8   :  { %v1477_v63 = vmul.f32 %v3202_v4, %v1476_v61 }
 0x3ba   :  { %v1478_v10 = vadd.f32 %v3202_v4, %v1477_v63 }
 0x3bc   :  { %v1482_v46 = vsel %vm1481_vm0, %v3202_v4, %v1478_v10 }
 0x3bd   :  { %v1487_v3 = vsel %vm1484_vm1, %v1486_v2, %v1482_v46 }
 0x3be   :  { %v1489_v5 = vmul.f32 %v1487_v3, %v1428_v15 }
 0x3c0   :  { %v1496_v0 = vpack.c.bf16 %v1489_v5, %v1489_v5  ;;  %v1490_v59 = vrot.slane %v1489_v5, 6  ;;  %v1492_v38 = vrot.slane %v1489_v5, 7 }
 0x3c2   :  { %1827 = vmatmul.bf16.vlgmr.msrb.gmra.mxu2 %v1496_v0  ;;  %v2908_v6 = vpack.c.bf16 %v1490_v59, %v1490_v59  ;;  %v2913_v7 = vpack.c.bf16 %v1492_v38, %v1492_v38 }
 0x3c4   :  { %2909 = vmatmul.msk.bf16.vlgmr.msrb.gmra.mxu0 %vm3450_vm4, %v2908_v6  ;;  %2914 = vmatmul.msk.bf16.vlgmr.msrb.gmra.mxu1 %vm3458_vm5, %v2913_v7 }
 0x3c5   :  { %2919 = vmatmul.msk.bf16.vlgmr.msrb.gmra.mxu3 %vm3450_vm4, %v2908_v6 }
 0x3d4   :  { %2924 = vmatmul.msk.bf16.vlgmr.msra.gmra.mxu0 %vm3458_vm5, %v2913_v7  ;;  %1866 = vmatmul.bf16.vlgmr.msra.gmra.mxu1 %v1496_v0 }
 0x441   :  { %v1802_v9 = vpop.f32.mrf.mxu0  ;;  %v1815_v11 = vpop.f32.mrf.mxu1 }
 0x442   :  { %v1803_v40 = vadd.f32 %v1802_v9, %v1549_v35 }
 0x444   :  { %v1816_v44 = vadd.f32 %v1815_v11, %v1803_v40 }
 0x445   :  { %v1828_v13 = vpop.f32.mrf.mxu2 }
 0x446   :  { %v1829_v16 = vadd.f32 %v1828_v13, %v1816_v44 }
 0x448   :  { %v1841_v17 = vpop.f32.mrf.mxu3 }
 0x449   :  { %v1804_v49 = vpop.f32.mrf.mxu0  ;;  %v1817_v18 = vpop.f32.mrf.mxu1  ;;  %v1842_v23 = vadd.f32 %v1841_v17, %v1550_v20 }
 0x44d   :  { %v1830_v21 = vpop.f32.mrf.mxu2 }
 0x450   :  { %v1843_v24 = vpop.f32.mrf.mxu3 }
 0x451   :  { %v1854_v26 = vpop.f32.mrf.mxu0  ;;  %v1867_v27 = vpop.f32.mrf.mxu1 }
 0x452   :  { %v1855_v28 = vadd.f32 %v1854_v26, %v1842_v23 }
 0x454   :  { %v1868_v29 = vadd.f32 %v1867_v27, %v1855_v28 }
 0x456   :  { %v2925_v30 = vmul.f32 -1.442695, %v1868_v29 }
 0x458   :  { %3203 = vpow2.f32 %v2925_v30 }
 0x459   :  { %v1856_v31 = vpop.f32.mrf.mxu0  ;;  %v1869_v32 = vpop.f32.mrf.mxu1 }
 0x45e   :  { %v3204_v33 = vpop.eup %3203 }
 0x45f   :  { %v1874_v34 = vadd.f32 1.0, %v3204_v33 }
 0x461   :  { %3205 = vrcp.f32 %v1874_v34  ;;  %v1886_v43 = vand.u32 2147483648, %v1874_v34  ;;  %v1884_v50 = vand.u32 2147483647, %v1874_v34  ;;  %vm1880_vm3 = vweird.f32 %v1874_v34 }
 0x463   :  { %v1887_v55 = vor.u32 1.1754944e-38, %v1886_v43  ;;  %vm1885_vm5 = vcmp.eq.f32.partialorder %v1884_v50, 8.507059e+37 }
 0x467   :  { %v3206_v36 = vpop.eup %3205 }
 0x468   :  { %v1876_v41 = vmul.f32 %v3206_v36, %v1874_v34  ;;  %vm1881_vm2 = vweird.f32 %v3206_v36 }
 0x469   :  { %vm1882_vm4 = vmor %vm1880_vm3, %vm1881_vm2 }
 0x46a   :  { %v1877_v42 = vsub.f32 1.0, %v1876_v41 }
 0x46c   :  { %v1878_v47 = vmul.f32 %v3206_v36, %v1877_v42 }
 0x46e   :  { %v1879_v51 = vadd.f32 %v3206_v36, %v1878_v47 }
 0x470   :  { %v1883_v54 = vsel %vm1882_vm4, %v3206_v36, %v1879_v51 }
 0x471   :  { %v1888_v22 = vsel %vm1885_vm5, %v1887_v55, %v1883_v54 }
 0x472   :  { %v1890_v56 = vmul.f32 %v1888_v22, %v1829_v16 }
 0x474   :  { %v1891_v37 = vpack.c.bf16 %v1890_v56, %v1890_v56 }
 0x476   :  { %1968 = vmatmul.bf16.vlgmr.msra.gmra.mxu2 %v1891_v37 }
 0x4f9   :  { %v1969_v4 = vpop.f32.mrf.mxu2 }
 0x4fa   :  { %v1970_v58 = vadd.f32 %v3190_v57, %v1969_v4 }
 0x4fc   :  { %1973 = vmax.xlane.f32.xlu0 %v1970_v58 }
 0x501   :  { %v1971_v60 = vpop.f32.mrf.mxu2 }
 0x56f   :  { %v1974_v61 = vpop.xlane.xlu0 %1973 }
 0x570   :  { %v1975_v62 = vsub.f32 %v1970_v58, %v1974_v61 }
 0x572   :  { %v1976_v45 = vmul.f32 1.442695, %v1975_v62 }
 0x574   :  { %3207 = vpow2.f32 %v1976_v45 }
 0x57a   :  { %v3208_v63 = vpop.eup %3207 }
 0x57b   :  { %1978 = vadd.xlane.f32.xlu1 %v3208_v63 }
 0x5ee   :  { %v1979_v48 = vpop.xlane.xlu1 %1978 }
 0x5ef   :  { %3209 = vlog2.f32 %v1979_v48 }
 0x5f5   :  { %v3210_v10 = vpop.eup %3209 }
 0x5f6   :  { %v1981_v2 = vmul.f32 0.6931472, %v3210_v10 }
 0x5f8   :  { %v1982_v15 = vadd.f32 %v1981_v2, %v1974_v61 }
 0x5fa   :  { %v1983_v46 = vsub.f32 %v1970_v58, %v1982_v15 }
 0x5fc   :  { %1984 = vst [vmem:[#allocation11] sm:$0xff] %v1983_v46 }
 0x5fd   :  { %1995 = dma.vmem_to_hbm [thread:$0]  %s1991_s2, 128, %s1993_s8, [#allocation4]  }
 0x5fe   :  { %3361 = dma.done.wait [#allocation4], 128  }
 0x5ff   :  { %3362 = vsyncadd [#allocation4], 4294967168 }
 0x600   :  { %2000 = vsyncpa [#allocation3], 1 }
 0x601   :  { %2001 = vsyncpa [#allocation6], 1 }
 0x602   :  { %2002 = vsyncpa [#allocation9], 1 }
 0x603   :  { %2003 = vsyncpa [#allocation4], 1 }

</bundles_post_ra>
